<compile_context>
chip_gen: v7x
topology: tpu7x:2x2x1
jax: 0.10.0
libtpu: 0.0.40
codegen_flags: <defaults>
</compile_context>

<pallas_src>
import functools

import jax
import jax.numpy as jnp
from jax.experimental import pallas as pl
from jax.experimental.pallas import tpu as pltpu


def _round_up(n, m):
    return ((n + m - 1) // m) * m


# ----------------------------------------------------------------------------
# In-kernel LayerNorm helper (f32).
# Uses sum/d_true and E[x^2]-mean^2 so zero-padded trailing feature columns
# (and zero-padded gamma/beta) never perturb the statistics.
# ----------------------------------------------------------------------------
def _ln_f32(x, gamma_ref, beta_ref, *, d_true, eps):
    inv_d = 1.0 / d_true
    mean = jnp.sum(x, axis=-1, keepdims=True) * inv_d
    mean_sq = jnp.sum(x * x, axis=-1, keepdims=True) * inv_d
    var = mean_sq - mean * mean
    y = (x - mean) * jax.lax.rsqrt(var + eps)
    return y * gamma_ref[...].astype(jnp.float32) + beta_ref[...].astype(jnp.float32)


# ----------------------------------------------------------------------------
# Multi-head attention core (shared by self- and cross-attention kernels).
# Returns residual + Wo @ softmax(Q K^T / sqrt(dh), mask) V + bo  (f32).
# ----------------------------------------------------------------------------
def _attention_core(q_in_f32, kv_in, mask, wq_ref, bq_ref, wk_ref, bk_ref,
                    wv_ref, bv_ref, wo_ref, bo_ref, residual_f32, ctx_ref, *,
                    nhead):
    w_dtype = wq_ref.dtype
    q_in = q_in_f32.astype(w_dtype)
    kv = kv_in.astype(w_dtype)

    q = jnp.dot(q_in, wq_ref[...], preferred_element_type=jnp.float32)
    q = q + bq_ref[...].astype(jnp.float32)
    k = jnp.dot(kv, wk_ref[...], preferred_element_type=jnp.float32)
    k = k + bk_ref[...].astype(jnp.float32)
    v = jnp.dot(kv, wv_ref[...], preferred_element_type=jnp.float32)
    v = v + bv_ref[...].astype(jnp.float32)

    d_model = q.shape[-1]
    dh = d_model // nhead
    scale = 1.0 / (dh ** 0.5)
    keep = mask > 0                     # torch masked_fill(mask == 0, -1e9)

    for h in range(nhead):              # static unroll; nhead is small
        sl = slice(h * dh, (h + 1) * dh)
        s = jnp.einsum('qd,kd->qk', q[:, sl], k[:, sl],
                       preferred_element_type=jnp.float32) * scale
        s = jnp.where(keep, s, -1e9)
        s = s - jnp.max(s, axis=-1, keepdims=True)
        p = jnp.exp(s)                  # attention dropout == identity (eval)
        l = jnp.sum(p, axis=-1, keepdims=True)
        inv = pl.reciprocal(l, approx=True)   # EUP slot
        inv = inv * (2.0 - l * inv)           # one Newton step -> f32-accurate
        p = p * inv
        # per-head context written into its lane slice of the VMEM scratch
        ctx_ref[:, sl] = jnp.dot(p, v[:, sl], preferred_element_type=jnp.float32)

    # Single concat-heads output projection: full-depth K = d_model matmul.
    out = jnp.dot(ctx_ref[...].astype(w_dtype), wo_ref[...],
                  preferred_element_type=jnp.float32)
    return residual_f32 + out + bo_ref[...].astype(jnp.float32)


def _self_attn_kernel(lid_ref, x_ref, mask_ref, g_ref, be_ref,
                      wq_ref, bq_ref, wk_ref, bk_ref, wv_ref, bv_ref,
                      wo_ref, bo_ref, o_ref, ctx_ref, *, nhead, eps):
    del lid_ref  # only consumed by the BlockSpec index_maps
    x = x_ref[0].astype(jnp.float32)                        # (Sq, D) residual
    x2 = _ln_f32(x, g_ref, be_ref, d_true=x.shape[-1], eps=eps)   # fused LN
    out = _attention_core(x2, x2, mask_ref[0], wq_ref, bq_ref, wk_ref, bk_ref,
                          wv_ref, bv_ref, wo_ref, bo_ref, x, ctx_ref,
                          nhead=nhead)
    o_ref[0] = out.astype(o_ref.dtype)


def _cross_attn_kernel(lid_ref, x_ref, enc_ref, mask_ref, g_ref, be_ref,
                       wq_ref, bq_ref, wk_ref, bk_ref, wv_ref, bv_ref,
                       wo_ref, bo_ref, o_ref, ctx_ref, *, nhead, eps):
    del lid_ref
    x = x_ref[0].astype(jnp.float32)
    x2 = _ln_f32(x, g_ref, be_ref, d_true=x.shape[-1], eps=eps)   # fused LN
    out = _attention_core(x2, enc_ref[0], mask_ref[0], wq_ref, bq_ref,
                          wk_ref, bk_ref, wv_ref, bv_ref, wo_ref, bo_ref,
                          x, ctx_ref, nhead=nhead)
    o_ref[0] = out.astype(o_ref.dtype)


def _attention_layer(x, enc, mask, ln_g, ln_b, p, lid, *, nhead, eps=1e-5):
    """x + MHA(LN(x), kv, kv, mask) with kv = LN(x) if enc is None else enc."""
    B, Sq, D = x.shape
    assert D % nhead == 0
    self_attn = enc is None
    Sk = Sq if self_attn else enc.shape[1]
    L = p["wq"].shape[0]

    w_spec = pl.BlockSpec((None, D, D), lambda b, lid_ref: (lid_ref[0], 0, 0))
    b_spec = pl.BlockSpec((None, 1, D), lambda b, lid_ref: (lid_ref[0], 0, 0))
    ln_spec = pl.BlockSpec((1, D), lambda b, lid_ref: (0, 0))
    act_spec = pl.BlockSpec((1, Sq, D), lambda b, lid_ref: (b, 0, 0))
    mask_spec = pl.BlockSpec((1, Sq, Sk), lambda b, lid_ref: (b, 0, 0))

    in_specs = [act_spec]
    inputs = [x]
    if not self_attn:
        in_specs.append(pl.BlockSpec((1, Sk, D), lambda b, lid_ref: (b, 0, 0)))
        inputs.append(enc)
    in_specs += [mask_spec, ln_spec, ln_spec]
    inputs += [mask, ln_g.reshape(1, D), ln_b.reshape(1, D)]
    for name in ("q", "k", "v", "o"):
        in_specs += [w_spec, b_spec]
        inputs += [p["w" + name], p["b" + name].reshape(L, 1, D)]

    kernel = _self_attn_kernel if self_attn else _cross_attn_kernel

    itemsize = jnp.dtype(x.dtype).itemsize
    w_item = jnp.dtype(p["wq"].dtype).itemsize
    kv_rows = Sq if self_attn else Sk
    flops = int(B * (4 * Sq * D * D + 4 * kv_rows * D * D + 4 * Sq * Sk * D))
    transcendentals = int(B * nhead * Sq * Sk)
    bytes_accessed = int(
        2 * B * Sq * D * itemsize
        + (0 if self_attn else B * Sk * D * jnp.dtype(enc.dtype).itemsize)
        + B * Sq * Sk * jnp.dtype(mask.dtype).itemsize
        + 4 * (D * D + D) * w_item          # only the selected language's slabs
        + 2 * D * jnp.dtype(ln_g.dtype).itemsize)

    return pl.pallas_call(
        functools.partial(kernel, nhead=nhead, eps=eps),
        out_shape=jax.ShapeDtypeStruct((B, Sq, D), x.dtype),
        grid_spec=pltpu.PrefetchScalarGridSpec(
            num_scalar_prefetch=1,
            grid=(B,),
            in_specs=in_specs,
            out_specs=pl.BlockSpec((1, Sq, D), lambda b, lid_ref: (b, 0, 0)),
            scratch_shapes=[pltpu.VMEM((Sq, D), jnp.float32)],   # concat-head ctx
        ),
        compiler_params=pltpu.CompilerParams(dimension_semantics=("parallel",)),
        cost_estimate=pl.CostEstimate(flops=flops,
                                      transcendentals=transcendentals,
                                      bytes_accessed=bytes_accessed),
    )(lid, *inputs)


# ----------------------------------------------------------------------------
# FeedForward kernel: fused LN + linear_1 + ReLU + linear_2 + residual.
# Rows tiled ("parallel"), d_ff tiled as trailing "arbitrary" reduction axis
# with an f32 VMEM accumulator; LN(x) computed once per row tile into scratch.
# ----------------------------------------------------------------------------
def _ffn_kernel(lid_ref, x_ref, g_ref, be_ref, w1_ref, b1_ref, w2_ref, b2_ref,
                o_ref, acc_ref, ln_ref, *, d_true, eps):
    del lid_ref
    k = pl.program_id(1)

    @pl.when(k == 0)
    def _():
        x = x_ref[...].astype(jnp.float32)
        ln_ref[...] = _ln_f32(x, g_ref, be_ref, d_true=d_true, eps=eps)
        acc_ref[...] = jnp.zeros_like(acc_ref)

    # linear_1 chunk + ReLU (dropout == identity in eval mode).
    h = jnp.dot(ln_ref[...].astype(w1_ref.dtype), w1_ref[...],
                preferred_element_type=jnp.float32)
    h = jnp.maximum(h + b1_ref[...].astype(jnp.float32), 0.0)
    # partial linear_2 over this d_ff chunk, accumulated in f32 VMEM scratch.
    acc_ref[...] += jnp.dot(h.astype(w2_ref.dtype), w2_ref[...],
                            preferred_element_type=jnp.float32)

    @pl.when(k == pl.num_programs(1) - 1)
    def _():
        y = (acc_ref[...] + b2_ref[...].astype(jnp.float32)
             + x_ref[...].astype(jnp.float32))          # residual fused in
        o_ref[...] = y.astype(o_ref.dtype)


def _feed_forward_layer(x, ln_g, ln_b, ff, lid, *, eps=1e-5, tm=512, tff=1024):
    """Returns x + linear_2(relu(linear_1(LN(x)))) with languageID weight select."""
    B, S, D = x.shape
    L, _, Dff = ff["w1"].shape
    M = B * S

    Dp = _round_up(D, 128)                       # lane-dense last dims
    tff = min(tff, _round_up(Dff, 128))
    Fp = _round_up(_round_up(Dff, 128), tff)
    tm = min(tm, _round_up(M, 8))
    Mp = _round_up(M, tm)

    def pad_last2(a, tgt0, tgt1):                # pads only when needed
        p0, p1 = tgt0 - a.shape[-2], tgt1 - a.shape[-1]
        if p0 or p1:
            pads = [(0, 0)] * (a.ndim - 2) + [(0, p0), (0, p1)]
            a = jnp.pad(a, pads)
        return a

    x2d = pad_last2(x.reshape(M, D), Mp, Dp)
    g2 = pad_last2(ln_g.reshape(1, D), 1, Dp)
    be2 = pad_last2(ln_b.reshape(1, D), 1, Dp)
    w1p = pad_last2(ff["w1"], Dp, Fp)
    b1p = pad_last2(ff["b1"].reshape(L, 1, Dff), 1, Fp)
    w2p = pad_last2(ff["w2"], Fp, Dp)
    b2p = pad_last2(ff["b2"].reshape(L, 1, D), 1, Dp)

    itemsize = jnp.dtype(x.dtype).itemsize
    w_item = jnp.dtype(ff["w1"].dtype).itemsize
    flops = int(4 * M * D * Dff)
    bytes_accessed = int(2 * Mp * Dp * itemsize
                         + (Mp // tm) * 2 * Dp * Fp * w_item)

    out = pl.pallas_call(
        functools.partial(_ffn_kernel, d_true=D, eps=eps),
        out_shape=jax.ShapeDtypeStruct((Mp, Dp), x.dtype),
        grid_spec=pltpu.PrefetchScalarGridSpec(
            num_scalar_prefetch=1,
            grid=(Mp // tm, Fp // tff),          # rows parallel, d_ff reduction last
            in_specs=[
                pl.BlockSpec((tm, Dp), lambda i, k, lid_ref: (i, 0)),     # x rows
                pl.BlockSpec((1, Dp), lambda i, k, lid_ref: (0, 0)),      # LN gamma
                pl.BlockSpec((1, Dp), lambda i, k, lid_ref: (0, 0)),      # LN beta
                pl.BlockSpec((None, Dp, tff),
                             lambda i, k, lid_ref: (lid_ref[0], 0, k)),   # W1 chunk
                pl.BlockSpec((None, 1, tff),
                             lambda i, k, lid_ref: (lid_ref[0], 0, k)),   # b1 chunk
                pl.BlockSpec((None, tff, Dp),
                             lambda i, k, lid_ref: (lid_ref[0], k, 0)),   # W2 chunk
                pl.BlockSpec((None, 1, Dp),
                             lambda i, k, lid_ref: (lid_ref[0], 0, 0)),   # b2
            ],
            out_specs=pl.BlockSpec((tm, Dp), lambda i, k, lid_ref: (i, 0)),
            scratch_shapes=[pltpu.VMEM((tm, Dp), jnp.float32),    # linear_2 acc
                            pltpu.VMEM((tm, Dp), jnp.float32)],   # LN(x) rows
        ),
        compiler_params=pltpu.CompilerParams(
            dimension_semantics=("parallel", "arbitrary")),
        cost_estimate=pl.CostEstimate(flops=flops, transcendentals=0,
                                      bytes_accessed=bytes_accessed),
    )(lid, x2d, g2, be2, w1p, b1p, w2p, b2p)

    if Mp != M or Dp != D:
        out = out[:M, :D]
    return out.reshape(B, S, D)


# ----------------------------------------------------------------------------
# Full decoder layer (dropouts identity in eval mode; debug print skipped)
# ----------------------------------------------------------------------------
def wf_transformer_decoder_layer(x, e_outputs, src_mask, trg_mask, language_id,
                                 params):
    nhead = params["nhead"]
    lid = jnp.asarray(language_id, dtype=jnp.int32).reshape((1,))

    # x2 = LN1(x); x = x + attn_1(x2, x2, x2, trg_mask)   (LN fused in-kernel)
    x = _attention_layer(x, None, trg_mask, params["ln1_g"], params["ln1_b"],
                         params["attn1"], lid, nhead=nhead)
    # x2 = LN2(x); x = x + attn_2(x2, e_out, e_out, src_mask)
    x = _attention_layer(x, e_outputs, src_mask, params["ln2_g"], params["ln2_b"],
                         params["attn2"], lid, nhead=nhead)
    # x2 = LN3(x); x = x + linear_2(relu(linear_1(x2)))
    x = _feed_forward_layer(x, params["ln3_g"], params["ln3_b"], params["ff"], lid)
    return x


# ----------------------------------------------------------------------------
# Pure-JAX reference
# ----------------------------------------------------------------------------
def _ref_layer_norm(x, g, b, eps=1e-5):
    m = jnp.mean(x, axis=-1, keepdims=True)
    v = jnp.mean((x - m) ** 2, axis=-1, keepdims=True)
    return (x - m) / jnp.sqrt(v + eps) * g + b


def _ref_mha(xq, kv, mask, p, nhead):
    B, Sq, D = xq.shape
    Sk = kv.shape[1]
    dh = D // nhead
    q = (xq @ p["wq"] + p["bq"]).reshape(B, Sq, nhead, dh).transpose(0, 2, 1, 3)
    k = (kv @ p["wk"] + p["bk"]).reshape(B, Sk, nhead, dh).transpose(0, 2, 1, 3)
    v = (kv @ p["wv"] + p["bv"]).reshape(B, Sk, nhead, dh).transpose(0, 2, 1, 3)
    s = jnp.einsum('bhqd,bhkd->bhqk', q, k) / (dh ** 0.5)
    s = jnp.where(mask[:, None, :, :] > 0, s, -1e9)
    a = jax.nn.softmax(s, axis=-1)
    o = jnp.einsum('bhqk,bhkd->bhqd', a, v).transpose(0, 2, 1, 3).reshape(B, Sq, D)
    return o @ p["wo"] + p["bo"]


def _ref_decoder_layer(x, e_out, src_mask, trg_mask, lid, params):
    nhead = params["nhead"]
    lang = lambda p: {k: v[lid] for k, v in p.items()}
    x2 = _ref_layer_norm(x, params["ln1_g"], params["ln1_b"])
    x = x + _ref_mha(x2, x2, trg_mask, lang(params["attn1"]), nhead)
    x2 = _ref_layer_norm(x, params["ln2_g"], params["ln2_b"])
    x = x + _ref_mha(x2, e_out, src_mask, lang(params["attn2"]), nhead)
    x2 = _ref_layer_norm(x, params["ln3_g"], params["ln3_b"])
    ff = lang(params["ff"])
    x = x + (jnp.maximum(x2 @ ff["w1"] + ff["b1"], 0.0) @ ff["w2"] + ff["b2"])
    return x


if __name__ == "__main__":
    B, Sq, Ss = 2, 8, 16
    d_model, nhead, d_ff, language_num = 128, 4, 256, 2
    language_id = 1

    keys = iter(jax.random.split(jax.random.PRNGKey(0), 64))

    def uniform(shape, lim):
        return jax.random.uniform(next(keys), shape, jnp.float32, -lim, lim)

    def linear_params(n_in, n_out):
        lim = 1.0 / (n_in ** 0.5)
        return (uniform((language_num, n_in, n_out), lim),
                uniform((language_num, n_out), lim))

    def attn_params():
        p = {}
        for name in ("q", "k", "v", "o"):
            w, b = linear_params(d_model, d_model)
            p["w" + name] = w
            p["b" + name] = b
        return p

    w1, b1 = linear_params(d_model, d_ff)
    w2, b2 = linear_params(d_ff, d_model)
    params = {
        "nhead": nhead,
        "ln1_g": 1.0 + 0.1 * jax.random.normal(next(keys), (d_model,)),
        "ln1_b": 0.1 * jax.random.normal(next(keys), (d_model,)),
        "ln2_g": 1.0 + 0.1 * jax.random.normal(next(keys), (d_model,)),
        "ln2_b": 0.1 * jax.random.normal(next(keys), (d_model,)),
        "ln3_g": 1.0 + 0.1 * jax.random.normal(next(keys), (d_model,)),
        "ln3_b": 0.1 * jax.random.normal(next(keys), (d_model,)),
        "attn1": attn_params(),
        "attn2": attn_params(),
        "ff": {"w1": w1, "b1": b1, "w2": w2, "b2": b2},
    }

    x = jax.random.normal(next(keys), (B, Sq, d_model), jnp.float32)
    e_out = jax.random.normal(next(keys), (B, Ss, d_model), jnp.float32)

    # 0/1 masks passed as bfloat16 (half the DMA of f32; exact masked_fill kept).
    trg_mask = jnp.tile(jnp.tril(jnp.ones((Sq, Sq), jnp.float32))[None],
                        (B, 1, 1)).astype(jnp.bfloat16)
    src_lens = jnp.array([Ss, Ss - 5])
    src_mask = (jnp.arange(Ss)[None, None, :] < src_lens[:, None, None])
    src_mask = jnp.tile(src_mask.astype(jnp.float32), (1, Sq, 1)).astype(jnp.bfloat16)

    y = wf_transformer_decoder_layer(x, e_out, src_mask, trg_mask, language_id,
                                     params)
    y = jax.block_until_ready(y)

    ref = _ref_decoder_layer(x, e_out, src_mask, trg_mask, language_id, params)
    assert y.shape == (B, Sq, d_model)
    assert jnp.allclose(y, ref, atol=1e-3, rtol=1e-3), \
        float(jnp.max(jnp.abs(y - ref)))

    print("KERNEL_OK")
</pallas_src>

<mosaic_0001>
module attributes {stable_mosaic.version = 11 : i64} {
  func.func @_self_attn_kernel(%arg0: i32, %arg1: memref<1xi32, #tpu.memory_space<smem>>, %arg2: memref<1x8x128xf32, #tpu.memory_space<vmem>>, %arg3: memref<1x8x8xbf16, #tpu.memory_space<vmem>>, %arg4: memref<1x128xf32, #tpu.memory_space<vmem>>, %arg5: memref<1x128xf32, #tpu.memory_space<vmem>>, %arg6: memref<1x128x128xf32, #tpu.memory_space<vmem>>, %arg7: memref<1x1x128xf32, #tpu.memory_space<vmem>>, %arg8: memref<1x128x128xf32, #tpu.memory_space<vmem>>, %arg9: memref<1x1x128xf32, #tpu.memory_space<vmem>>, %arg10: memref<1x128x128xf32, #tpu.memory_space<vmem>>, %arg11: memref<1x1x128xf32, #tpu.memory_space<vmem>>, %arg12: memref<1x128x128xf32, #tpu.memory_space<vmem>>, %arg13: memref<1x1x128xf32, #tpu.memory_space<vmem>>, %arg14: memref<1x8x128xf32, #tpu.memory_space<vmem>>, %arg15: memref<8x128xf32, #tpu.memory_space<vmem>>) attributes {dimension_semantics = [#tpu.dimension_semantics<parallel>], iteration_bounds = array<i64: 2>, scalar_prefetch = 1 : i64, scratch_operands = 1 : i64, tpu.core_type = #tpu.core_type<tc>, window_params = [{transform_indices = @transform_0, window_bounds = array<i64: 1, 8, 128>}, {transform_indices = @transform_1, window_bounds = array<i64: 1, 8, 8>}, {pipeline_mode = #tpu.pipeline_mode<synchronous>, transform_indices = @transform_2, window_bounds = array<i64: 1, 128>}, {pipeline_mode = #tpu.pipeline_mode<synchronous>, transform_indices = @transform_3, window_bounds = array<i64: 1, 128>}, {transform_indices = @transform_4, window_bounds = array<i64: 1, 128, 128>}, {transform_indices = @transform_5, window_bounds = array<i64: 1, 1, 128>}, {transform_indices = @transform_6, window_bounds = array<i64: 1, 128, 128>}, {transform_indices = @transform_7, window_bounds = array<i64: 1, 1, 128>}, {transform_indices = @transform_8, window_bounds = array<i64: 1, 128, 128>}, {transform_indices = @transform_9, window_bounds = array<i64: 1, 1, 128>}, {transform_indices = @transform_10, window_bounds = array<i64: 1, 128, 128>}, {transform_indices = @transform_11, window_bounds = array<i64: 1, 1, 128>}, {transform_indices = @transform_12, window_bounds = array<i64: 1, 8, 128>}]} {
    %c0 = arith.constant 0 : index
    %c0_0 = arith.constant 0 : index
    %c0_1 = arith.constant 0 : index
    %0 = vector.load %arg2[%c0, %c0_0, %c0_1] : memref<1x8x128xf32, #tpu.memory_space<vmem>>, vector<1x8x128xf32>
    %1 = vector.shape_cast %0 : vector<1x8x128xf32> to vector<8x128xf32>
    %cst = arith.constant dense<0.000000e+00> : vector<8xf32>
    %2 = vector.multi_reduction <add>, %1, %cst [1] : vector<8x128xf32> to vector<8xf32>
    %3 = vector.shape_cast %2 : vector<8xf32> to vector<8x1xf32>
    %cst_2 = arith.constant 7.812500e-03 : f32
    %4 = vector.broadcast %cst_2 : f32 to vector<8x1xf32>
    %5 = arith.mulf %3, %4 : vector<8x1xf32>
    %6 = arith.mulf %1, %1 : vector<8x128xf32>
    %cst_3 = arith.constant dense<0.000000e+00> : vector<8xf32>
    %7 = vector.multi_reduction <add>, %6, %cst_3 [1] : vector<8x128xf32> to vector<8xf32>
    %8 = vector.shape_cast %7 : vector<8xf32> to vector<8x1xf32>
    %cst_4 = arith.constant 7.812500e-03 : f32
    %9 = vector.broadcast %cst_4 : f32 to vector<8x1xf32>
    %10 = arith.mulf %8, %9 : vector<8x1xf32>
    %11 = arith.mulf %5, %5 : vector<8x1xf32>
    %12 = arith.subf %10, %11 : vector<8x1xf32>
    %13 = vector.broadcast %5 : vector<8x1xf32> to vector<8x128xf32>
    %14 = arith.subf %1, %13 : vector<8x128xf32>
    %cst_5 = arith.constant 9.99999974E-6 : f32
    %15 = vector.broadcast %cst_5 : f32 to vector<8x1xf32>
    %16 = arith.addf %12, %15 : vector<8x1xf32>
    %17 = math.rsqrt %16 : vector<8x1xf32>
    %18 = vector.broadcast %17 : vector<8x1xf32> to vector<8x128xf32>
    %19 = arith.mulf %14, %18 : vector<8x128xf32>
    %c0_6 = arith.constant 0 : index
    %c0_7 = arith.constant 0 : index
    %20 = vector.load %arg4[%c0_6, %c0_7] : memref<1x128xf32, #tpu.memory_space<vmem>>, vector<1x128xf32>
    %21 = vector.broadcast %20 : vector<1x128xf32> to vector<8x128xf32>
    %22 = arith.mulf %19, %21 : vector<8x128xf32>
    %c0_8 = arith.constant 0 : index
    %c0_9 = arith.constant 0 : index
    %23 = vector.load %arg5[%c0_8, %c0_9] : memref<1x128xf32, #tpu.memory_space<vmem>>, vector<1x128xf32>
    %24 = vector.broadcast %23 : vector<1x128xf32> to vector<8x128xf32>
    %25 = arith.addf %22, %24 : vector<8x128xf32>
    %c0_10 = arith.constant 0 : index
    %c0_11 = arith.constant 0 : index
    %c0_12 = arith.constant 0 : index
    %26 = vector.load %arg3[%c0_10, %c0_11, %c0_12] : memref<1x8x8xbf16, #tpu.memory_space<vmem>>, vector<1x8x8xbf16>
    %27 = vector.shape_cast %26 : vector<1x8x8xbf16> to vector<8x8xbf16>
    %c0_13 = arith.constant 0 : index
    %c0_14 = arith.constant 0 : index
    %c0_15 = arith.constant 0 : index
    %28 = vector.load %arg6[%c0_13, %c0_14, %c0_15] : memref<1x128x128xf32, #tpu.memory_space<vmem>>, vector<1x128x128xf32>
    %29 = vector.shape_cast %28 : vector<1x128x128xf32> to vector<128x128xf32>
    %cst_16 = arith.constant dense<0.000000e+00> : vector<8x128xf32>
    %30 = tpu.matmul %25, %29, %cst_16 {dimension_numbers = #tpu.dot_dimension_numbers<[1], [0], [0], [1], [0, 0, 1, 1], [], []>} : vector<8x128xf32>, vector<128x128xf32>, vector<8x128xf32> -> vector<8x128xf32>
    %c0_17 = arith.constant 0 : index
    %c0_18 = arith.constant 0 : index
    %c0_19 = arith.constant 0 : index
    %31 = vector.load %arg7[%c0_17, %c0_18, %c0_19] : memref<1x1x128xf32, #tpu.memory_space<vmem>>, vector<1x1x128xf32>
    %32 = vector.shape_cast %31 : vector<1x1x128xf32> to vector<1x128xf32>
    %33 = vector.broadcast %32 : vector<1x128xf32> to vector<8x128xf32>
    %34 = arith.addf %30, %33 : vector<8x128xf32>
    %c0_20 = arith.constant 0 : index
    %c0_21 = arith.constant 0 : index
    %c0_22 = arith.constant 0 : index
    %35 = vector.load %arg8[%c0_20, %c0_21, %c0_22] : memref<1x128x128xf32, #tpu.memory_space<vmem>>, vector<1x128x128xf32>
    %36 = vector.shape_cast %35 : vector<1x128x128xf32> to vector<128x128xf32>
    %cst_23 = arith.constant dense<0.000000e+00> : vector<8x128xf32>
    %37 = tpu.matmul %25, %36, %cst_23 {dimension_numbers = #tpu.dot_dimension_numbers<[1], [0], [0], [1], [0, 0, 1, 1], [], []>} : vector<8x128xf32>, vector<128x128xf32>, vector<8x128xf32> -> vector<8x128xf32>
    %c0_24 = arith.constant 0 : index
    %c0_25 = arith.constant 0 : index
    %c0_26 = arith.constant 0 : index
    %38 = vector.load %arg9[%c0_24, %c0_25, %c0_26] : memref<1x1x128xf32, #tpu.memory_space<vmem>>, vector<1x1x128xf32>
    %39 = vector.shape_cast %38 : vector<1x1x128xf32> to vector<1x128xf32>
    %40 = vector.broadcast %39 : vector<1x128xf32> to vector<8x128xf32>
    %41 = arith.addf %37, %40 : vector<8x128xf32>
    %c0_27 = arith.constant 0 : index
    %c0_28 = arith.constant 0 : index
    %c0_29 = arith.constant 0 : index
    %42 = vector.load %arg10[%c0_27, %c0_28, %c0_29] : memref<1x128x128xf32, #tpu.memory_space<vmem>>, vector<1x128x128xf32>
    %43 = vector.shape_cast %42 : vector<1x128x128xf32> to vector<128x128xf32>
    %cst_30 = arith.constant dense<0.000000e+00> : vector<8x128xf32>
    %44 = tpu.matmul %25, %43, %cst_30 {dimension_numbers = #tpu.dot_dimension_numbers<[1], [0], [0], [1], [0, 0, 1, 1], [], []>} : vector<8x128xf32>, vector<128x128xf32>, vector<8x128xf32> -> vector<8x128xf32>
    %c0_31 = arith.constant 0 : index
    %c0_32 = arith.constant 0 : index
    %c0_33 = arith.constant 0 : index
    %45 = vector.load %arg11[%c0_31, %c0_32, %c0_33] : memref<1x1x128xf32, #tpu.memory_space<vmem>>, vector<1x1x128xf32>
    %46 = vector.shape_cast %45 : vector<1x1x128xf32> to vector<1x128xf32>
    %47 = vector.broadcast %46 : vector<1x128xf32> to vector<8x128xf32>
    %48 = arith.addf %44, %47 : vector<8x128xf32>
    %cst_34 = arith.constant 0.000000e+00 : bf16
    %49 = vector.broadcast %cst_34 : bf16 to vector<8x8xbf16>
    %50 = arith.cmpf ogt, %27, %49 : vector<8x8xbf16>
    %51 = vector.extract_strided_slice %34 {offsets = [0, 0], sizes = [8, 32], strides = [1, 1]} : vector<8x128xf32> to vector<8x32xf32>
    %52 = vector.extract_strided_slice %41 {offsets = [0, 0], sizes = [8, 32], strides = [1, 1]} : vector<8x128xf32> to vector<8x32xf32>
    "tpu.trace_start"() <{level = 10 : i32, message = "qd,kd->qk"}> : () -> ()
    %cst_35 = arith.constant dense<0.000000e+00> : vector<8x8xf32>
    %53 = tpu.matmul %51, %52, %cst_35 {dimension_numbers = #tpu.dot_dimension_numbers<[1], [1], [0], [0], [0, 0, 1, 0], [], []>} : vector<8x32xf32>, vector<8x32xf32>, vector<8x8xf32> -> vector<8x8xf32>
    "tpu.trace_stop"() : () -> ()
    %cst_36 = arith.constant 0.176776692 : f32
    %54 = vector.broadcast %cst_36 : f32 to vector<8x8xf32>
    %55 = arith.mulf %53, %54 : vector<8x8xf32>
    %cst_37 = arith.constant -1.000000e+09 : f32
    %56 = vector.broadcast %cst_37 : f32 to vector<8x8xf32>
    %57 = arith.select %50, %55, %56 : vector<8x8xi1>, vector<8x8xf32>
    %cst_38 = arith.constant dense<0xFF800000> : vector<8xf32>
    %58 = vector.multi_reduction <maximumf>, %57, %cst_38 [1] : vector<8x8xf32> to vector<8xf32>
    %59 = vector.shape_cast %58 : vector<8xf32> to vector<8x1xf32>
    %60 = vector.broadcast %59 : vector<8x1xf32> to vector<8x8xf32>
    %61 = arith.subf %57, %60 : vector<8x8xf32>
    %62 = math.exp %61 : vector<8x8xf32>
    %cst_39 = arith.constant dense<0.000000e+00> : vector<8xf32>
    %63 = vector.multi_reduction <add>, %62, %cst_39 [1] : vector<8x8xf32> to vector<8xf32>
    %64 = vector.shape_cast %63 : vector<8xf32> to vector<8x1xf32>
    %65 = tpu.reciprocal %64 {approx = true} : vector<8x1xf32> -> vector<8x1xf32>
    %66 = arith.mulf %64, %65 : vector<8x1xf32>
    %cst_40 = arith.constant 2.000000e+00 : f32
    %67 = vector.broadcast %cst_40 : f32 to vector<8x1xf32>
    %68 = arith.subf %67, %66 : vector<8x1xf32>
    %69 = arith.mulf %65, %68 : vector<8x1xf32>
    %70 = vector.broadcast %69 : vector<8x1xf32> to vector<8x8xf32>
    %71 = arith.mulf %62, %70 : vector<8x8xf32>
    %72 = vector.extract_strided_slice %48 {offsets = [0, 0], sizes = [8, 32], strides = [1, 1]} : vector<8x128xf32> to vector<8x32xf32>
    %cst_41 = arith.constant dense<0.000000e+00> : vector<8x32xf32>
    %73 = tpu.matmul %71, %72, %cst_41 {dimension_numbers = #tpu.dot_dimension_numbers<[1], [0], [0], [1], [0, 0, 1, 1], [], []>} : vector<8x8xf32>, vector<8x32xf32>, vector<8x32xf32> -> vector<8x32xf32>
    %c0_42 = arith.constant 0 : index
    %c0_43 = arith.constant 0 : index
    %74 = vector.load %arg15[%c0_42, %c0_43] : memref<8x128xf32, #tpu.memory_space<vmem>>, vector<8x32xf32>
    tpu.vector_store %arg15[%c0_42, %c0_43], %73 {strides = array<i32>} : memref<8x128xf32, #tpu.memory_space<vmem>>, vector<8x32xf32>,
    %75 = vector.extract_strided_slice %34 {offsets = [0, 32], sizes = [8, 32], strides = [1, 1]} : vector<8x128xf32> to vector<8x32xf32>
    %76 = vector.extract_strided_slice %41 {offsets = [0, 32], sizes = [8, 32], strides = [1, 1]} : vector<8x128xf32> to vector<8x32xf32>
    "tpu.trace_start"() <{level = 10 : i32, message = "qd,kd->qk"}> : () -> ()
    %cst_44 = arith.constant dense<0.000000e+00> : vector<8x8xf32>
    %77 = tpu.matmul %75, %76, %cst_44 {dimension_numbers = #tpu.dot_dimension_numbers<[1], [1], [0], [0], [0, 0, 1, 0], [], []>} : vector<8x32xf32>, vector<8x32xf32>, vector<8x8xf32> -> vector<8x8xf32>
    "tpu.trace_stop"() : () -> ()
    %cst_45 = arith.constant 0.176776692 : f32
    %78 = vector.broadcast %cst_45 : f32 to vector<8x8xf32>
    %79 = arith.mulf %77, %78 : vector<8x8xf32>
    %cst_46 = arith.constant -1.000000e+09 : f32
    %80 = vector.broadcast %cst_46 : f32 to vector<8x8xf32>
    %81 = arith.select %50, %79, %80 : vector<8x8xi1>, vector<8x8xf32>
    %cst_47 = arith.constant dense<0xFF800000> : vector<8xf32>
    %82 = vector.multi_reduction <maximumf>, %81, %cst_47 [1] : vector<8x8xf32> to vector<8xf32>
    %83 = vector.shape_cast %82 : vector<8xf32> to vector<8x1xf32>
    %84 = vector.broadcast %83 : vector<8x1xf32> to vector<8x8xf32>
    %85 = arith.subf %81, %84 : vector<8x8xf32>
    %86 = math.exp %85 : vector<8x8xf32>
    %cst_48 = arith.constant dense<0.000000e+00> : vector<8xf32>
    %87 = vector.multi_reduction <add>, %86, %cst_48 [1] : vector<8x8xf32> to vector<8xf32>
    %88 = vector.shape_cast %87 : vector<8xf32> to vector<8x1xf32>
    %89 = tpu.reciprocal %88 {approx = true} : vector<8x1xf32> -> vector<8x1xf32>
    %90 = arith.mulf %88, %89 : vector<8x1xf32>
    %cst_49 = arith.constant 2.000000e+00 : f32
    %91 = vector.broadcast %cst_49 : f32 to vector<8x1xf32>
    %92 = arith.subf %91, %90 : vector<8x1xf32>
    %93 = arith.mulf %89, %92 : vector<8x1xf32>
    %94 = vector.broadcast %93 : vector<8x1xf32> to vector<8x8xf32>
    %95 = arith.mulf %86, %94 : vector<8x8xf32>
    %96 = vector.extract_strided_slice %48 {offsets = [0, 32], sizes = [8, 32], strides = [1, 1]} : vector<8x128xf32> to vector<8x32xf32>
    %cst_50 = arith.constant dense<0.000000e+00> : vector<8x32xf32>
    %97 = tpu.matmul %95, %96, %cst_50 {dimension_numbers = #tpu.dot_dimension_numbers<[1], [0], [0], [1], [0, 0, 1, 1], [], []>} : vector<8x8xf32>, vector<8x32xf32>, vector<8x32xf32> -> vector<8x32xf32>
    %c0_51 = arith.constant 0 : index
    %c32 = arith.constant 32 : index
    %98 = vector.load %arg15[%c0_51, %c32] : memref<8x128xf32, #tpu.memory_space<vmem>>, vector<8x32xf32>
    tpu.vector_store %arg15[%c0_51, %c32], %97 {strides = array<i32>} : memref<8x128xf32, #tpu.memory_space<vmem>>, vector<8x32xf32>,
    %99 = vector.extract_strided_slice %34 {offsets = [0, 64], sizes = [8, 32], strides = [1, 1]} : vector<8x128xf32> to vector<8x32xf32>
    %100 = vector.extract_strided_slice %41 {offsets = [0, 64], sizes = [8, 32], strides = [1, 1]} : vector<8x128xf32> to vector<8x32xf32>
    "tpu.trace_start"() <{level = 10 : i32, message = "qd,kd->qk"}> : () -> ()
    %cst_52 = arith.constant dense<0.000000e+00> : vector<8x8xf32>
    %101 = tpu.matmul %99, %100, %cst_52 {dimension_numbers = #tpu.dot_dimension_numbers<[1], [1], [0], [0], [0, 0, 1, 0], [], []>} : vector<8x32xf32>, vector<8x32xf32>, vector<8x8xf32> -> vector<8x8xf32>
    "tpu.trace_stop"() : () -> ()
    %cst_53 = arith.constant 0.176776692 : f32
    %102 = vector.broadcast %cst_53 : f32 to vector<8x8xf32>
    %103 = arith.mulf %101, %102 : vector<8x8xf32>
    %cst_54 = arith.constant -1.000000e+09 : f32
    %104 = vector.broadcast %cst_54 : f32 to vector<8x8xf32>
    %105 = arith.select %50, %103, %104 : vector<8x8xi1>, vector<8x8xf32>
    %cst_55 = arith.constant dense<0xFF800000> : vector<8xf32>
    %106 = vector.multi_reduction <maximumf>, %105, %cst_55 [1] : vector<8x8xf32> to vector<8xf32>
    %107 = vector.shape_cast %106 : vector<8xf32> to vector<8x1xf32>
    %108 = vector.broadcast %107 : vector<8x1xf32> to vector<8x8xf32>
    %109 = arith.subf %105, %108 : vector<8x8xf32>
    %110 = math.exp %109 : vector<8x8xf32>
    %cst_56 = arith.constant dense<0.000000e+00> : vector<8xf32>
    %111 = vector.multi_reduction <add>, %110, %cst_56 [1] : vector<8x8xf32> to vector<8xf32>
    %112 = vector.shape_cast %111 : vector<8xf32> to vector<8x1xf32>
    %113 = tpu.reciprocal %112 {approx = true} : vector<8x1xf32> -> vector<8x1xf32>
    %114 = arith.mulf %112, %113 : vector<8x1xf32>
    %cst_57 = arith.constant 2.000000e+00 : f32
    %115 = vector.broadcast %cst_57 : f32 to vector<8x1xf32>
    %116 = arith.subf %115, %114 : vector<8x1xf32>
    %117 = arith.mulf %113, %116 : vector<8x1xf32>
    %118 = vector.broadcast %117 : vector<8x1xf32> to vector<8x8xf32>
    %119 = arith.mulf %110, %118 : vector<8x8xf32>
    %120 = vector.extract_strided_slice %48 {offsets = [0, 64], sizes = [8, 32], strides = [1, 1]} : vector<8x128xf32> to vector<8x32xf32>
    %cst_58 = arith.constant dense<0.000000e+00> : vector<8x32xf32>
    %121 = tpu.matmul %119, %120, %cst_58 {dimension_numbers = #tpu.dot_dimension_numbers<[1], [0], [0], [1], [0, 0, 1, 1], [], []>} : vector<8x8xf32>, vector<8x32xf32>, vector<8x32xf32> -> vector<8x32xf32>
    %c0_59 = arith.constant 0 : index
    %c64 = arith.constant 64 : index
    %122 = vector.load %arg15[%c0_59, %c64] : memref<8x128xf32, #tpu.memory_space<vmem>>, vector<8x32xf32>
    tpu.vector_store %arg15[%c0_59, %c64], %121 {strides = array<i32>} : memref<8x128xf32, #tpu.memory_space<vmem>>, vector<8x32xf32>,
    %123 = vector.extract_strided_slice %34 {offsets = [0, 96], sizes = [8, 32], strides = [1, 1]} : vector<8x128xf32> to vector<8x32xf32>
    %124 = vector.extract_strided_slice %41 {offsets = [0, 96], sizes = [8, 32], strides = [1, 1]} : vector<8x128xf32> to vector<8x32xf32>
    "tpu.trace_start"() <{level = 10 : i32, message = "qd,kd->qk"}> : () -> ()
    %cst_60 = arith.constant dense<0.000000e+00> : vector<8x8xf32>
    %125 = tpu.matmul %123, %124, %cst_60 {dimension_numbers = #tpu.dot_dimension_numbers<[1], [1], [0], [0], [0, 0, 1, 0], [], []>} : vector<8x32xf32>, vector<8x32xf32>, vector<8x8xf32> -> vector<8x8xf32>
    "tpu.trace_stop"() : () -> ()
    %cst_61 = arith.constant 0.176776692 : f32
    %126 = vector.broadcast %cst_61 : f32 to vector<8x8xf32>
    %127 = arith.mulf %125, %126 : vector<8x8xf32>
    %cst_62 = arith.constant -1.000000e+09 : f32
    %128 = vector.broadcast %cst_62 : f32 to vector<8x8xf32>
    %129 = arith.select %50, %127, %128 : vector<8x8xi1>, vector<8x8xf32>
    %cst_63 = arith.constant dense<0xFF800000> : vector<8xf32>
    %130 = vector.multi_reduction <maximumf>, %129, %cst_63 [1] : vector<8x8xf32> to vector<8xf32>
    %131 = vector.shape_cast %130 : vector<8xf32> to vector<8x1xf32>
    %132 = vector.broadcast %131 : vector<8x1xf32> to vector<8x8xf32>
    %133 = arith.subf %129, %132 : vector<8x8xf32>
    %134 = math.exp %133 : vector<8x8xf32>
    %cst_64 = arith.constant dense<0.000000e+00> : vector<8xf32>
    %135 = vector.multi_reduction <add>, %134, %cst_64 [1] : vector<8x8xf32> to vector<8xf32>
    %136 = vector.shape_cast %135 : vector<8xf32> to vector<8x1xf32>
    %137 = tpu.reciprocal %136 {approx = true} : vector<8x1xf32> -> vector<8x1xf32>
    %138 = arith.mulf %136, %137 : vector<8x1xf32>
    %cst_65 = arith.constant 2.000000e+00 : f32
    %139 = vector.broadcast %cst_65 : f32 to vector<8x1xf32>
    %140 = arith.subf %139, %138 : vector<8x1xf32>
    %141 = arith.mulf %137, %140 : vector<8x1xf32>
    %142 = vector.broadcast %141 : vector<8x1xf32> to vector<8x8xf32>
    %143 = arith.mulf %134, %142 : vector<8x8xf32>
    %144 = vector.extract_strided_slice %48 {offsets = [0, 96], sizes = [8, 32], strides = [1, 1]} : vector<8x128xf32> to vector<8x32xf32>
    %cst_66 = arith.constant dense<0.000000e+00> : vector<8x32xf32>
    %145 = tpu.matmul %143, %144, %cst_66 {dimension_numbers = #tpu.dot_dimension_numbers<[1], [0], [0], [1], [0, 0, 1, 1], [], []>} : vector<8x8xf32>, vector<8x32xf32>, vector<8x32xf32> -> vector<8x32xf32>
    %c0_67 = arith.constant 0 : index
    %c96 = arith.constant 96 : index
    %146 = vector.load %arg15[%c0_67, %c96] : memref<8x128xf32, #tpu.memory_space<vmem>>, vector<8x32xf32>
    tpu.vector_store %arg15[%c0_67, %c96], %145 {strides = array<i32>} : memref<8x128xf32, #tpu.memory_space<vmem>>, vector<8x32xf32>,
    %c0_68 = arith.constant 0 : index
    %c0_69 = arith.constant 0 : index
    %147 = vector.load %arg15[%c0_68, %c0_69] : memref<8x128xf32, #tpu.memory_space<vmem>>, vector<8x128xf32>
    %c0_70 = arith.constant 0 : index
    %c0_71 = arith.constant 0 : index
    %c0_72 = arith.constant 0 : index
    %148 = vector.load %arg12[%c0_70, %c0_71, %c0_72] : memref<1x128x128xf32, #tpu.memory_space<vmem>>, vector<1x128x128xf32>
    %149 = vector.shape_cast %148 : vector<1x128x128xf32> to vector<128x128xf32>
    %cst_73 = arith.constant dense<0.000000e+00> : vector<8x128xf32>
    %150 = tpu.matmul %147, %149, %cst_73 {dimension_numbers = #tpu.dot_dimension_numbers<[1], [0], [0], [1], [0, 0, 1, 1], [], []>} : vector<8x128xf32>, vector<128x128xf32>, vector<8x128xf32> -> vector<8x128xf32>
    %151 = arith.addf %1, %150 : vector<8x128xf32>
    %c0_74 = arith.constant 0 : index
    %c0_75 = arith.constant 0 : index
    %c0_76 = arith.constant 0 : index
    %152 = vector.load %arg13[%c0_74, %c0_75, %c0_76] : memref<1x1x128xf32, #tpu.memory_space<vmem>>, vector<1x1x128xf32>
    %153 = vector.shape_cast %152 : vector<1x1x128xf32> to vector<1x128xf32>
    %154 = vector.broadcast %153 : vector<1x128xf32> to vector<8x128xf32>
    %155 = arith.addf %151, %154 : vector<8x128xf32>
    %c0_77 = arith.constant 0 : index
    %c0_78 = arith.constant 0 : index
    %c0_79 = arith.constant 0 : index
    %156 = vector.load %arg14[%c0_77, %c0_78, %c0_79] : memref<1x8x128xf32, #tpu.memory_space<vmem>>, vector<1x8x128xf32>
    %157 = vector.shape_cast %156 : vector<1x8x128xf32> to vector<8x128xf32>
    %158 = vector.shape_cast %155 : vector<8x128xf32> to vector<1x8x128xf32>
    tpu.vector_store %arg14[%c0_77, %c0_78, %c0_79], %158 {strides = array<i32>} : memref<1x8x128xf32, #tpu.memory_space<vmem>>, vector<1x8x128xf32>,
    return
  }
  func.func @transform_0(%arg0: i32, %arg1: memref<1xi32, #tpu.memory_space<smem>>) -> (i32, i32, i32) {
    %c0_i32 = arith.constant 0 : i32
    %c0_i32_0 = arith.constant 0 : i32
    %c0_i32_1 = arith.constant 0 : i32
    return %arg0, %c0_i32, %c0_i32_0 : i32, i32, i32
  }
  func.func @transform_1(%arg0: i32, %arg1: memref<1xi32, #tpu.memory_space<smem>>) -> (i32, i32, i32) {
    %c0_i32 = arith.constant 0 : i32
    %c0_i32_0 = arith.constant 0 : i32
    %c0_i32_1 = arith.constant 0 : i32
    return %arg0, %c0_i32, %c0_i32_0 : i32, i32, i32
  }
  func.func @transform_2(%arg0: i32, %arg1: memref<1xi32, #tpu.memory_space<smem>>) -> (i32, i32) {
    %c0_i32 = arith.constant 0 : i32
    %c0_i32_0 = arith.constant 0 : i32
    %c0_i32_1 = arith.constant 0 : i32
    return %c0_i32, %c0_i32_0 : i32, i32
  }
  func.func @transform_3(%arg0: i32, %arg1: memref<1xi32, #tpu.memory_space<smem>>) -> (i32, i32) {
    %c0_i32 = arith.constant 0 : i32
    %c0_i32_0 = arith.constant 0 : i32
    %c0_i32_1 = arith.constant 0 : i32
    return %c0_i32, %c0_i32_0 : i32, i32
  }
  func.func @transform_4(%arg0: i32, %arg1: memref<1xi32, #tpu.memory_space<smem>>) -> (i32, i32, i32) {
    %c0 = arith.constant 0 : index
    %0 = memref.load %arg1[%c0] : memref<1xi32, #tpu.memory_space<smem>>
    %c0_i32 = arith.constant 0 : i32
    %c0_i32_0 = arith.constant 0 : i32
    %c0_i32_1 = arith.constant 0 : i32
    return %0, %c0_i32, %c0_i32_0 : i32, i32, i32
  }
  func.func @transform_5(%arg0: i32, %arg1: memref<1xi32, #tpu.memory_space<smem>>) -> (i32, i32, i32) {
    %c0 = arith.constant 0 : index
    %0 = memref.load %arg1[%c0] : memref<1xi32, #tpu.memory_space<smem>>
    %c0_i32 = arith.constant 0 : i32
    %c0_i32_0 = arith.constant 0 : i32
    %c0_i32_1 = arith.constant 0 : i32
    return %0, %c0_i32, %c0_i32_0 : i32, i32, i32
  }
  func.func @transform_6(%arg0: i32, %arg1: memref<1xi32, #tpu.memory_space<smem>>) -> (i32, i32, i32) {
    %c0 = arith.constant 0 : index
    %0 = memref.load %arg1[%c0] : memref<1xi32, #tpu.memory_space<smem>>
    %c0_i32 = arith.constant 0 : i32
    %c0_i32_0 = arith.constant 0 : i32
    %c0_i32_1 = arith.constant 0 : i32
    return %0, %c0_i32, %c0_i32_0 : i32, i32, i32
  }
  func.func @transform_7(%arg0: i32, %arg1: memref<1xi32, #tpu.memory_space<smem>>) -> (i32, i32, i32) {
    %c0 = arith.constant 0 : index
    %0 = memref.load %arg1[%c0] : memref<1xi32, #tpu.memory_space<smem>>
    %c0_i32 = arith.constant 0 : i32
    %c0_i32_0 = arith.constant 0 : i32
    %c0_i32_1 = arith.constant 0 : i32
    return %0, %c0_i32, %c0_i32_0 : i32, i32, i32
  }
  func.func @transform_8(%arg0: i32, %arg1: memref<1xi32, #tpu.memory_space<smem>>) -> (i32, i32, i32) {
    %c0 = arith.constant 0 : index
    %0 = memref.load %arg1[%c0] : memref<1xi32, #tpu.memory_space<smem>>
    %c0_i32 = arith.constant 0 : i32
    %c0_i32_0 = arith.constant 0 : i32
    %c0_i32_1 = arith.constant 0 : i32
    return %0, %c0_i32, %c0_i32_0 : i32, i32, i32
  }
  func.func @transform_9(%arg0: i32, %arg1: memref<1xi32, #tpu.memory_space<smem>>) -> (i32, i32, i32) {
    %c0 = arith.constant 0 : index
    %0 = memref.load %arg1[%c0] : memref<1xi32, #tpu.memory_space<smem>>
    %c0_i32 = arith.constant 0 : i32
    %c0_i32_0 = arith.constant 0 : i32
    %c0_i32_1 = arith.constant 0 : i32
    return %0, %c0_i32, %c0_i32_0 : i32, i32, i32
  }
  func.func @transform_10(%arg0: i32, %arg1: memref<1xi32, #tpu.memory_space<smem>>) -> (i32, i32, i32) {
    %c0 = arith.constant 0 : index
    %0 = memref.load %arg1[%c0] : memref<1xi32, #tpu.memory_space<smem>>
    %c0_i32 = arith.constant 0 : i32
    %c0_i32_0 = arith.constant 0 : i32
    %c0_i32_1 = arith.constant 0 : i32
    return %0, %c0_i32, %c0_i32_0 : i32, i32, i32
  }
  func.func @transform_11(%arg0: i32, %arg1: memref<1xi32, #tpu.memory_space<smem>>) -> (i32, i32, i32) {
    %c0 = arith.constant 0 : index
    %0 = memref.load %arg1[%c0] : memref<1xi32, #tpu.memory_space<smem>>
    %c0_i32 = arith.constant 0 : i32
    %c0_i32_0 = arith.constant 0 : i32
    %c0_i32_1 = arith.constant 0 : i32
    return %0, %c0_i32, %c0_i32_0 : i32, i32, i32
  }
  func.func @transform_12(%arg0: i32, %arg1: memref<1xi32, #tpu.memory_space<smem>>) -> (i32, i32, i32) {
    %c0_i32 = arith.constant 0 : i32
    %c0_i32_0 = arith.constant 0 : i32
    %c0_i32_1 = arith.constant 0 : i32
    return %arg0, %c0_i32, %c0_i32_0 : i32, i32, i32
  }
}

</mosaic_0001>

<bundles_post_ra>
// kernel: tpu_custom_call.1
= control target key start
LH: loop header
LB: loop body
LE: loop exit
PB: predicated region body
PF: predicated region fallthrough
CT: control target
= control target key end

     0   :  { %s3659_s0 = inlined_call_operand.<no memory space> [shape: s32[1], index: 0, kind: input, shape index: {}]   ;;  %s3660_s1 = inlined_call_operand.hbm [shape: f32[2,8,128], index: 1, kind: input, shape index: {}]   ;;  %s3661_s2 = inlined_call_operand.hbm [shape: bf16[2,8,8], index: 2, kind: input, shape index: {}]   ;;  %s3662_s3 = inlined_call_operand.vmem [shape: f32[1,128], index: 3, kind: input, shape index: {}]   ;;  %s3663_s4 = inlined_call_operand.vmem [shape: f32[1,128], index: 4, kind: input, shape index: {}]   ;;  %s3664_s5 = inlined_call_operand.hbm [shape: f32[2,128,128], index: 5, kind: input, shape index: {}]   ;;  %s3665_s6 = inlined_call_operand.vmem [shape: f32[2,1,128], index: 6, kind: input, shape index: {}]   ;;  %s3666_s7 = inlined_call_operand.hbm [shape: f32[2,128,128], index: 7, kind: input, shape index: {}]   ;;  %s3667_s8 = inlined_call_operand.vmem [shape: f32[2,1,128], index: 8, kind: input, shape index: {}]   ;;  %s3668_s9 = inlined_call_operand.hbm [shape: f32[2,128,128], index: 9, kind: input, shape index: {}]   ;;  %s3669_s10 = inlined_call_operand.vmem [shape: f32[2,1,128], index: 10, kind: input, shape index: {}]   ;;  %s3670_s11 = inlined_call_operand.hbm [shape: f32[2,128,128], index: 11, kind: input, shape index: {}]   ;;  %s3671_s12 = inlined_call_operand.vmem [shape: f32[2,1,128], index: 12, kind: input, shape index: {}]   ;;  %s3672_s13 = inlined_call_operand.hbm [shape: f32[2,8,128], index: 13, kind: output, shape index: {}]  }
   0x1   :  { %3696 = sst [smem:[#allocation29_spill]] %s3660_s1 }
   0x2   :  { %3697 = sst [smem:[#allocation30_spill]] %s3663_s4 }
   0x3   :  { %3698 = sst [smem:[#allocation31_spill]] %s3664_s5 }
   0x4   :  { %3699 = sst [smem:[#allocation32_spill]] %s3665_s6 }
   0x5   :  { %3700 = sst [smem:[#allocation33_spill]] %s3666_s7 }
   0x6   :  { %3701 = sst [smem:[#allocation34_spill]] %s3667_s8 }
   0x7   :  { %3702 = sst [smem:[#allocation35_spill]] %s3668_s9 }
   0x8   :  { %3703 = sst [smem:[#allocation36_spill]] %s3669_s10 }
   0x9   :  { %3704 = sst [smem:[#allocation37_spill]] %s3670_s11 }
   0xa   :  { %3705 = sst [smem:[#allocation38_spill]] %s3671_s12 }
   0xb   :  { %3706 = sst [smem:[#allocation39_spill]] %s3672_s13 }
   0xc   :  { %18 = sst [smem:[#allocation4]] %s3659_s0 }
   0xd   :  { %19 = vsyncpa [#allocation6], 0 }
   0xe   :  { %21 = vsyncpa [#allocation6 + $0x1], 0 }
   0xf   :  { %22 = vsyncpa [#allocation9], 0 }
  0x10   :  { %24 = vsyncpa [#allocation9 + $0x1], 0 }
  0x11   :  { %25 = vsyncpa [#allocation12], 0 }
  0x12   :  { %26 = vsyncpa [#allocation15], 0 }
  0x13   :  { %27 = vsyncpa [#allocation7], 0 }
  0x14   :  { %29 = vsyncpa [#allocation7 + $0x1], 0  ;;  %s3011_s27 = smov 0   ;;  %s3013_s28 = smov 0  }
  0x15   :  { %s3015_s29 = smov 0   ;;  %s3017_s30 = smov 0  }
  0x16   :  { %s3019_s14 = smov 0   ;;  %s3021_s15 = smov 0  }
  0x17   :  { %s3023_s0 = smov 0   ;;  %s3025_s16 = smov 0  }
  0x18   :  { %s3027_s17 = smov 0   ;;  %s3029_s18 = smov 0  }
  0x19   :  { %s3031_s19 = smov 0   ;;  %s3033_s20 = smov 0  }
  0x1a LB: > { %3707 = sst [smem:[#allocation24_spill]] %s2888_s30  ;;  %s3070_s21 = sadd.s32 4294967295, %s2920_s20   ;;  %s2920_s20 = sphi %s3033_s20, %s3771_s20   ;;  %s2916_s19 = sphi %s3031_s19, %s3766_s19   ;;  %s2912_s18 = sphi %s3029_s18, %s3770_s18   ;;  %s2908_s17 = sphi %s3027_s17, %s3769_s17   ;;  %s2904_s16 = sphi %s3025_s16, %s3645_s16   ;;  %s2900_s0 = sphi %s3023_s0, %s3764_s0   ;;  %s2896_s15 = sphi %s3021_s15, %s3640_s15   ;;  %s2892_s14 = sphi %s3019_s14, %s3763_s14   ;;  %s2888_s30 = sphi %s3017_s30, %s3635_s30   ;;  %s2884_s29 = sphi %s3015_s29, %s3762_s29   ;;  %s2880_s28 = sphi %s3013_s28, %s3630_s28   ;;  %s2876_s27 = sphi %s3011_s27, %s3768_s27  }
  0x1b   : > { %3708 = sst [smem:[#allocation25_spill]] %s2896_s15  ;;  %s133_s22 = sld [smem:[#allocation4]] }
  0x1c   : > { %3709 = sst [smem:[#allocation26_spill]] %s2904_s16  ;;  %p3676_p0 = scmp.eq.s32.totalorder %s3070_s21, 0 }
  0x1d   : > { %3710 = sst [smem:[#allocation27_spill]] %s2916_s19  ;;  %p151_p1 = scmp.ne.s32.totalorder %s2904_s16, %s2900_s0 }
  0x1e   : > { %p1971_p3 = scmp.ge.s32.totalorder %s2920_s20, 1  ;;  %p384_p4 = scmp.lt.s32.totalorder %s2920_s20, 3 }
  0x1f   : > { %p3076_p2 = por %p151_p1, %p3676_p0  ;;  %s3713_s5 = sld [smem:[#allocation31_spill]] }
  0x20   : > { %p3084_p5 = pnand %p1971_p3, %p384_p4  ;;  %s2922_s16 = smov [#allocation10]  }
  0x21   : > { %s3711_s23 = scalar_select %p3076_p2, 1, 0 }
  0x22   : > { %s3082_s24 = sshll.u32 %s133_s22, 11  ;;  %s406_s12 = sshll.u32 %s2922_s16, 4  ;;  %s3096_s12 = int_to_ptr.vmem [resolvable:$true] %s406_s12 }
  0x23   : > { %s3712_s25 = scalar_select %p3084_p5, 1, 0 }
  0x24   : > { %p3675_p6 = pneg %p3084_p5 }
  0x25   : > { %s3092_s0 = scalar_lea.hbm %s3713_s5, %s3082_s24  ;;  %s2579_s10 = scalar_lea.hbm %s3713_s5, 4096 }
  0x26   : > { %p3103_p7 = pnand %p3675_p6, %p3076_p2  ;;  %s2574_s13 = scalar_lea.hbm %s3092_s0, 2048 }
  0x27   : > { %p2575_p9 = scmp.ne.s32.totalorder %s3092_s0, %s2574_s13  ;;  %p2580_p13 = scmp.lt.u32.totalorder %s3092_s0, %s3713_s5 }
  0x28   : > { %p2576_p10 = pneg %p3103_p7  ;;  %p2581_p1 = scmp.lt.u32.totalorder %s2579_s10, %s2574_s13 }
  0x29   : > { %p2583_p4 = scmp.lt.u32.totalorder %s2574_s13, %s3092_s0 }
  0x2a   : > { %p2577_p11 = pnand %p2576_p10, %p2575_p9  ;;  %p2582_p3 = por %p2581_p1, %p2580_p13 }
  0x2c   : > { %p2578_p12 = pneg %p2577_p11  ;;  %p2584_p8 = por %p2583_p4, %p2582_p3 }
  0x2e   : > { %p2585_p6 = pnand %p2584_p8, %p2578_p12 }
  0x30   : > { %2588 = shalt.err (!%p2585_p6)
}
  0x31   : > { %s2589_s4 = scalar_lea.vmem %s3096_s12, 2048  ;;  %p2597_p2 = scmp.lt.s32.totalorder %s3096_s12, %s3096_s12 }
  0x32   : > { %p2590_p9 = scmp.ne.s32.totalorder %s3096_s12, %s2589_s4  ;;  %p2598_p5 = scmp.lt.s32.totalorder %s2589_s4, %s2589_s4 }
  0x34   : > { %p2592_p11 = pnand %p2590_p9, %p2576_p10  ;;  %p2599_p1 = por %p2598_p5, %p2597_p2 }
  0x36   : > { %p2593_p0 = pneg %p2592_p11 }
  0x38   : > { %p2600_p13 = pnand %p2599_p1, %p2593_p0 }
  0x3a   : > { %2603 = shalt.err (!%p2600_p13)
}
  0x3b   : > { %s3681_s6 = smov 128   ;;  %s3683_s8 = smov 8  }
  0x3c   : > { %2392 = dma.hbm_to_vmem [thread:$0]  (!%p3103_p7), %s3092_s0, 2048, %s3096_s12, [#allocation9], %s3681_s6, %s3681_s6, %s3683_s8  }
  0x3d   : > { %s3715_s7 = sld [smem:[#allocation33_spill]]  ;;  %p207_p0 = scmp.ne.s32.totalorder %s2896_s15, %s2892_s14 }
  0x3e   : > { %s2925_s16 = smov [#allocation11]   ;;  %p3716_p2 = scmp.eq.s32.totalorder %s3070_s21, 0 }
  0x3f   : > { %s431_s26 = sshll.u32 %s2925_s16, 4  ;;  %p3718_p6 = scmp.ne.s32.totalorder %s3712_s25, 0  ;;  %s3151_s26 = int_to_ptr.vmem [resolvable:$true] %s431_s26 }
  0x40   : > { %p3147_p5 = por %p207_p0, %p3716_p2  ;;  %s3721_s9 = sld [smem:[#allocation35_spill]] }
  0x41   : > { %p3719_p7 = pneg %p3718_p6 }
  0x42   : > { %s3717_s5 = scalar_select %p3147_p5, 1, 0 }
  0x43   : > { %s3141_s13 = scalar_lea.hbm %s3715_s7, %s3082_s24  ;;  %p3158_p8 = pnand %p3719_p7, %p3147_p5 }
  0x44   : > { %s2604_s4 = scalar_lea.hbm %s3141_s13, 2048  ;;  %s2609_s6 = scalar_lea.hbm %s3715_s7, 4096 }
  0x45   : > { %p2605_p12 = scmp.ne.s32.totalorder %s3141_s13, %s2604_s4  ;;  %p2606_p3 = pneg %p3158_p8 }
  0x46   : > { %s3168_s22 = scalar_lea.hbm %s3721_s9, %s3082_s24  ;;  %p2610_p11 = scmp.lt.u32.totalorder %s3141_s13, %s3715_s7 }
  0x47   : > { %p2607_p4 = pnand %p2606_p3, %p2605_p12  ;;  %p2611_p1 = scmp.lt.u32.totalorder %s2609_s6, %s2604_s4 }
  0x48   : > { %p2613_p0 = scmp.lt.u32.totalorder %s2604_s4, %s3141_s13 }
  0x49   : > { %p2608_p9 = pneg %p2607_p4  ;;  %p2612_p13 = por %p2611_p1, %p2610_p11 }
  0x4b   : > { %p2614_p2 = por %p2613_p0, %p2612_p13 }
  0x4d   : > { %p2615_p7 = pnand %p2614_p2, %p2608_p9 }
  0x4f   : > { %2618 = shalt.err (!%p2615_p7)
}
  0x50   : > { %s2619_s14 = scalar_lea.vmem %s3151_s26, 2048  ;;  %p2627_p5 = scmp.lt.s32.totalorder %s3151_s26, %s3151_s26 }
  0x51   : > { %p2620_p12 = scmp.ne.s32.totalorder %s3151_s26, %s2619_s14  ;;  %p2628_p6 = scmp.lt.s32.totalorder %s2619_s14, %s2619_s14 }
  0x53   : > { %p2622_p4 = pnand %p2620_p12, %p2606_p3  ;;  %p2629_p1 = por %p2628_p6, %p2627_p5 }
  0x55   : > { %p2623_p10 = pneg %p2622_p4 }
  0x57   : > { %p2630_p11 = pnand %p2629_p1, %p2623_p10 }
  0x59   : > { %2633 = shalt.err (!%p2630_p11)
}
  0x5a   : > { %s3722_s15 = smov 8   ;;  %s3723_s6 = smov 128  }
  0x5b   : > { %2395 = dma.hbm_to_vmem [thread:$0]  (!%p3158_p8), %s3141_s13, 2048, %s3151_s26, [#allocation12], %s3723_s6, %s3723_s6, %s3722_s15  }
  0x5c   : > { %p3724_p5 = scmp.eq.s32.totalorder %s3070_s21, 0  ;;  %p3725_p6 = scmp.ne.s32.totalorder %s2888_s30, %s2884_s29 }
  0x5d   : > { %s2926_s12 = smov [#allocation13]   ;;  %p3727_p3 = scmp.ne.s32.totalorder %s3712_s25, 0 }
  0x5e   : > { %p3204_p10 = por %p3725_p6, %p3724_p5  ;;  %s456_s0 = sshll.u32 %s2926_s12, 4  ;;  %s457_s0 = int_to_ptr.vmem [resolvable:$true] %s456_s0 }
  0x5f   : > { %p3728_p9 = pneg %p3727_p3  ;;  %s2634_s29 = scalar_lea.hbm %s3168_s22, 2048 }
  0x60   : > { %s3726_s8 = scalar_select %p3204_p10, 1, 0 }
  0x61   : > { %p3213_p13 = pnand %p3728_p9, %p3204_p10  ;;  %p2635_p0 = scmp.ne.s32.totalorder %s3168_s22, %s2634_s29 }
  0x62   : > { %s2639_s10 = scalar_lea.hbm %s3721_s9, 4096  ;;  %p2640_p4 = scmp.lt.u32.totalorder %s3168_s22, %s3721_s9 }
  0x63   : > { %p2636_p2 = pneg %p3213_p13  ;;  %p2641_p1 = scmp.lt.u32.totalorder %s2639_s10, %s2634_s29 }
  0x64   : > { %p2643_p5 = scmp.lt.u32.totalorder %s2634_s29, %s3168_s22 }
  0x65   : > { %p2637_p7 = pnand %p2636_p2, %p2635_p0  ;;  %p2642_p11 = por %p2641_p1, %p2640_p4 }
  0x67   : > { %p2638_p12 = pneg %p2637_p7  ;;  %p2644_p6 = por %p2643_p5, %p2642_p11 }
  0x69   : > { %p2645_p9 = pnand %p2644_p6, %p2638_p12 }
  0x6b   : > { %2648 = shalt.err (!%p2645_p9)
}
  0x6c   : > { %s2649_s12 = scalar_lea.vmem %s457_s0, 2048  ;;  %p2657_p10 = scmp.lt.s32.totalorder %s457_s0, %s457_s0 }
  0x6d   : > { %p2650_p8 = scmp.ne.s32.totalorder %s457_s0, %s2649_s12  ;;  %p2658_p3 = scmp.lt.s32.totalorder %s2649_s12, %s2649_s12 }
  0x6f   : > { %p2652_p0 = pnand %p2650_p8, %p2636_p2  ;;  %p2659_p1 = por %p2658_p3, %p2657_p10 }
  0x71   : > { %p2653_p7 = pneg %p2652_p0 }
  0x73   : > { %p2660_p4 = pnand %p2659_p1, %p2653_p7 }
  0x75   : > { %2663 = shalt.err (!%p2660_p4)
}
  0x76   : > { %2398 = dma.hbm_to_vmem [thread:$0]  (!%p3213_p13), %s3168_s22, 2048, %s457_s0, [#allocation12], %s3723_s6, %s3723_s6, %s3722_s15  }
  0x77   : > { %p3730_p12 = scmp.eq.s32.totalorder %s3070_s21, 0  ;;  %p3731_p8 = scmp.ne.s32.totalorder %s2880_s28, %s2876_s27 }
  0x78   : > { %s3733_s11 = sld [smem:[#allocation37_spill]]  ;;  %s2927_s10 = smov [#allocation14]  }
  0x79   : > { %p3248_p2 = por %p3731_p8, %p3730_p12  ;;  %s481_s16 = sshll.u32 %s2927_s10, 4  ;;  %s482_s16 = int_to_ptr.vmem [resolvable:$true] %s481_s16 }
  0x7a   : > { %p3734_p10 = scmp.ne.s32.totalorder %s3712_s25, 0 }
  0x7b   : > { %s3732_s29 = scalar_select %p3248_p2, 1, 0 }
  0x7c   : > { %p3735_p3 = pneg %p3734_p10 }
  0x7e   : > { %s3256_s4 = scalar_lea.hbm %s3733_s11, %s3082_s24  ;;  %p3263_p13 = pnand %p3735_p3, %p3248_p2 }
  0x7f   : > { %s2664_s22 = scalar_lea.hbm %s3256_s4, 2048  ;;  %s2669_s14 = scalar_lea.hbm %s3733_s11, 4096 }
  0x80   : > { %p2665_p11 = scmp.ne.s32.totalorder %s3256_s4, %s2664_s22  ;;  %p2666_p5 = pneg %p3263_p13 }
  0x81   : > { %p2670_p0 = scmp.lt.u32.totalorder %s3256_s4, %s3733_s11  ;;  %p2671_p7 = scmp.lt.u32.totalorder %s2669_s14, %s2664_s22 }
  0x82   : > { %p2667_p6 = pnand %p2666_p5, %p2665_p11  ;;  %p2673_p4 = scmp.lt.u32.totalorder %s2664_s22, %s3256_s4 }
  0x83   : > { %p2672_p1 = por %p2671_p7, %p2670_p0 }
  0x84   : > { %p2668_p9 = pneg %p2667_p6 }
  0x85   : > { %p2674_p12 = por %p2673_p4, %p2672_p1 }
  0x87   : > { %p2675_p8 = pnand %p2674_p12, %p2668_p9 }
  0x89   : > { %2678 = shalt.err (!%p2675_p8)
}
  0x8a   : > { %s2679_s26 = scalar_lea.vmem %s482_s16, 2048  ;;  %p2687_p2 = scmp.lt.s32.totalorder %s482_s16, %s482_s16 }
  0x8b   : > { %p2680_p3 = scmp.ne.s32.totalorder %s482_s16, %s2679_s26  ;;  %p2688_p10 = scmp.lt.s32.totalorder %s2679_s26, %s2679_s26 }
  0x8d   : > { %p2682_p11 = pnand %p2680_p3, %p2666_p5  ;;  %p2689_p0 = por %p2688_p10, %p2687_p2 }
  0x8f   : > { %p2683_p6 = pneg %p2682_p11 }
  0x91   : > { %p2690_p7 = pnand %p2689_p0, %p2683_p6 }
  0x93   : > { %2693 = shalt.err (!%p2690_p7)
}
  0x94   : > { %2401 = dma.hbm_to_vmem [thread:$0]  (!%p3263_p13), %s3256_s4, 2048, %s482_s16, [#allocation15], %s3723_s6, %s3723_s6, %s3722_s15  }
  0x95   : > { %s1970_s10 = sadd.s32 4294967294, %s2920_s20   ;;  %s3293_s27 = sadd.s32 1, %s2920_s20  }
  0x96   : > { %s42_s22 = sadd.s32 1, %s2916_s19  ;;  %s39_s24 = ssub.s32 %s2920_s20, %s3293_s27 }
  0x97   : > { %p49_p2 = scmp.ne.s32.totalorder %s2916_s19, %s2912_s18  ;;  %p40_p10 = scmp.eq.s32.totalorder %s39_s24, 0 }
  0x98   : > { %p50_p5 = scmp.eq.s32.totalorder %s2920_s20, 0  ;;  %p55_p9 = scmp.ne.s32.totalorder %s2912_s18, %s2908_s17 }
  0x99   : > { %p371_p1 = scmp.eq.s32.totalorder %s3070_s21, 1  ;;  %p3738_p12 = scmp.eq.s32.totalorder %s3070_s21, 0 }
  0x9a   : > { %s3305_s0 = scalar_select %p40_p10, %s2916_s19, %s42_s22  }
  0x9b   : > { %p51_p4 = por %p50_p5, %p49_p2  ;;  %p3309_p8 = por %p3738_p12, %p55_p9 }
  0x9c   : > { %3737 = sst [smem:[#allocation28_spill]] %s3305_s0  ;;  %p3313_p13 = por %p371_p1, %p49_p2 }
  0x9d   : > { %s3739_s15 = scalar_select %p3309_p8, 1, 0 }
  0x9e   : > { %s3740_s6 = scalar_select %p3313_p13, 1, 0 }
  0x9f   : > { %p377_p3 = scmp.eq.s32.totalorder %s1970_s10, 1  ;;  %p2413_p11 = scmp.lt.s32.totalorder %s2920_s20, 2 }
  0xa0   : > { %s3319_s4 = sand.u32 1, %s2916_s19   ;;  %s1982_s12 = sshll.u32 %s2920_s20, 7 }
  0xa1   : > { %p3321_p6 = por %p377_p3, %p55_p9  ;;  %s1981_s14 = sshll.u32 %s3319_s4, 3 }
  0xa2   : > { %s3742_s1 = sld [smem:[#allocation29_spill]]  ;;  %s507_s10 = scalar_lea.vmem [#allocation5], %s1981_s14 }
  0xa3   : > { %s3741_s16 = scalar_select %p3321_p6, 1, 0 }
  0xa4   : > { %s514_s24 = sshll.u32 %s507_s10, 4  ;;  %p3332_p0 = pnand %p2413_p11, %p51_p4  ;;  %s3336_s24 = int_to_ptr.vmem [resolvable:$true] %s514_s24 }
  0xa5   : > { %s504_s11 = scalar_lea.sflag [#allocation6], %s3319_s4 }
  0xa6   : > { %p2696_p2 = pneg %p3332_p0 }
  0xa8   : > { %s3330_s22 = scalar_lea.hbm %s3742_s1, %s1982_s12  ;;  %s2699_s13 = scalar_lea.hbm %s3742_s1, 256 }
  0xa9   : > { %s2694_s0 = scalar_lea.hbm %s3330_s22, 128  ;;  %p2700_p9 = scmp.lt.u32.totalorder %s3330_s22, %s3742_s1 }
  0xaa   : > { %p2695_p7 = scmp.ne.s32.totalorder %s3330_s22, %s2694_s0  ;;  %p2701_p1 = scmp.lt.u32.totalorder %s2699_s13, %s2694_s0 }
  0xab   : > { %p2703_p12 = scmp.lt.u32.totalorder %s2694_s0, %s3330_s22 }
  0xac   : > { %p2697_p10 = pnand %p2696_p2, %p2695_p7  ;;  %p2702_p4 = por %p2701_p1, %p2700_p9 }
  0xae   : > { %p2698_p5 = pneg %p2697_p10  ;;  %p2704_p3 = por %p2703_p12, %p2702_p4 }
  0xb0   : > { %p2705_p11 = pnand %p2704_p3, %p2698_p5 }
  0xb2   : > { %2708 = shalt.err (!%p2705_p11)
}
  0xb3   : > { %s2709_s9 = scalar_lea.vmem %s3336_s24, 128  ;;  %s2928_s14 = smov [#allocation5]  }
  0xb4   : > { %p2710_p7 = scmp.ne.s32.totalorder %s3336_s24, %s2709_s9  ;;  %s2714_s12 = sshll.u32 %s2928_s14, 4  ;;  %s2715_s12 = int_to_ptr.vmem [resolvable:$false] %s2714_s12 }
  0xb5   : > { %s2716_s26 = scalar_lea.vmem %s2715_s12, 256  ;;  %p2717_p13 = scmp.lt.s32.totalorder %s3336_s24, %s2715_s12 }
  0xb6   : > { %p2712_p10 = pnand %p2710_p7, %p2696_p2  ;;  %p2718_p9 = scmp.lt.s32.totalorder %s2716_s26, %s2709_s9 }
  0xb8   : > { %p2713_p6 = pneg %p2712_p10  ;;  %p2719_p1 = por %p2718_p9, %p2717_p13 }
  0xba   : > { %p2720_p4 = pnand %p2719_p1, %p2713_p6 }
  0xbc   : > { %2723 = shalt.err (!%p2720_p4)
}
  0xbd   : > { %2405 = dma.hbm_to_vmem [thread:$0]  (!%p3332_p0), %s3330_s22, 128, %s3336_s24, %s504_s11  }
  0xbe   : > { %s1983_s0 = sshll.u32 %s3319_s4, 2  ;;  %s1984_s13 = sshll.u32 %s2920_s20, 6 }
  0xbf   : > { %s3370_s1 = scalar_lea.hbm %s3661_s2, %s1984_s13  ;;  %s525_s9 = scalar_lea.vmem [#allocation8], %s1983_s0 }
  0xc0   : > { %s532_s12 = sshll.u32 %s525_s9, 4  ;;  %s3744_s26 = sand.u32 1, %s2920_s20   ;;  %s533_s12 = int_to_ptr.vmem [resolvable:$true] %s532_s12 }
  0xc1   : > { %s522_s19 = scalar_lea.sflag [#allocation9], %s3744_s26  ;;  %s2724_s30 = scalar_lea.hbm %s3370_s1, 64 }
  0xc2   : > { %p2725_p13 = scmp.ne.s32.totalorder %s3370_s1, %s2724_s30  ;;  %s2729_s22 = scalar_lea.hbm %s3661_s2, 128 }
  0xc3   : > { %p2730_p12 = scmp.lt.u32.totalorder %s3370_s1, %s3661_s2  ;;  %p2731_p3 = scmp.lt.u32.totalorder %s2729_s22, %s2724_s30 }
  0xc4   : > { %p2727_p6 = pnand %p2725_p13, %p2696_p2  ;;  %p2733_p7 = scmp.lt.u32.totalorder %s2724_s30, %s3370_s1 }
  0xc5   : > { %p2732_p11 = por %p2731_p3, %p2730_p12 }
  0xc6   : > { %p2728_p5 = pneg %p2727_p6 }
  0xc7   : > { %p2734_p10 = por %p2733_p7, %p2732_p11 }
  0xc9   : > { %p2735_p9 = pnand %p2734_p10, %p2728_p5 }
  0xcb   : > { %2738 = shalt.err (!%p2735_p9)
}
  0xcc   : > { %s2739_s0 = scalar_lea.vmem %s533_s12, 64  ;;  %s2929_s10 = smov [#allocation8]  }
  0xcd   : > { %p2740_p1 = scmp.ne.s32.totalorder %s533_s12, %s2739_s0  ;;  %s2744_s14 = sshll.u32 %s2929_s10, 4  ;;  %s2745_s14 = int_to_ptr.vmem [resolvable:$false] %s2744_s14 }
  0xce   : > { %s2746_s9 = scalar_lea.vmem %s2745_s14, 128  ;;  %p2747_p6 = scmp.lt.s32.totalorder %s533_s12, %s2745_s14 }
  0xcf   : > { %p2742_p4 = pnand %p2740_p1, %p2696_p2  ;;  %p2748_p8 = scmp.lt.s32.totalorder %s2746_s9, %s2739_s0 }
  0xd1   : > { %p2743_p13 = pneg %p2742_p4  ;;  %p2749_p3 = por %p2748_p8, %p2747_p6 }
  0xd3   : > { %p2750_p12 = pnand %p2749_p3, %p2743_p13 }
  0xd5   : > { %2753 = shalt.err (!%p2750_p12)
}
  0xd6   : > { %2408 = dma.hbm_to_vmem [thread:$0]  (!%p3332_p0), %s3370_s1, 64, %s533_s12, %s522_s19  }
  0xd7   : > { %p3745_p5 = scmp.ne.s32.totalorder %s3712_s25, 0 }
  0xd8   : > { %s3396_s30 = sand.u32 (!%p3745_p5), 1, %s2912_s18   ;;  %p3746_p8 = scmp.ne.s32.totalorder (!%p3745_p5), %s3739_s15, 0 }
  0xd9   : > { %541 = sbr.rel (%p3745_p5) target bundleno = 3345 (0xd11), region = 68  ;;  %s1986_s26 = sshll.u32 (!%p3745_p5), %s3396_s30, 3 }
  0xda   : > { %s544_s11 = scalar_lea.sflag (!%p3745_p5), [#allocation6], %s3396_s30  ;;  %s547_s4 = scalar_lea.vmem (!%p3745_p5), [#allocation5], %s1986_s26 }
  0xe0   : > { %2847 = dma.done.wait (%p3746_p8), %s544_s11, 128  }
  0xe1   : > { %2849 = vsyncadd (%p3746_p8), %s544_s11, 4294967168  ;;  %s552_s1 = sand.u32 1, %s3070_s21   ;;  %s1987_s7 = sshll.u32 %s3396_s30, 2 }
  0xe2   : > { %s553_s19 = scalar_lea.sflag [#allocation9], %s552_s1  ;;  %s3408_s25 = scalar_lea.vmem [#allocation8], %s1987_s7 }
  0xe3   : > { %2851 = dma.done.wait (%p3746_p8), %s553_s19, 64  }
  0xe4   : > { %2853 = vsyncadd (%p3746_p8), %s553_s19, 4294967232  ;;  %p3747_p0 = scmp.ne.s32.totalorder %s3711_s23, 0 }
  0xe6   : > { %2855 = dma.done.wait (%p3747_p0), [#allocation9], 2048  }
  0xe7   : > { %2857 = vsyncadd (%p3747_p0), [#allocation9], 4294965248  ;;  %p3748_p2 = scmp.ne.s32.totalorder %s3717_s5, 0 }
  0xe9   : > { %2859 = dma.done.wait (%p3748_p2), [#allocation12], 2048  }
  0xea   : > { %2861 = vsyncadd (%p3748_p2), [#allocation12], 4294965248  ;;  %p3749_p11 = scmp.ne.s32.totalorder %s3726_s8, 0 }
  0xec   : > { %2863 = dma.done.wait (%p3749_p11), [#allocation12], 2048  }
  0xed   : > { %2865 = vsyncadd (%p3749_p11), [#allocation12], 4294965248  ;;  %p3750_p7 = scmp.ne.s32.totalorder %s3732_s29, 0 }
  0xef   : > { %2867 = dma.done.wait (%p3750_p7), [#allocation15], 2048  }
  0xf0   : > { %2869 = vsyncadd (%p3750_p7), [#allocation15], 4294965248  ;;  %v2930_v0 = vmov 0.0|0.0   ;;  %v3432_v1 = vld [vmem:[%s547_s4] sm:$0xff]  ;;  %v692_v2 = vld [vmem:[#allocation10] sm:$0xff]  ;;  %vm2931_vm0 = vmmov 0  }
  0xf1   : > { %2279 = vmatprep.subr.bf16.mxu0 %v2930_v0  ;;  %2303 = vmatprep.subr.bf16.mxu1 %v2930_v0  ;;  %v693_v3 = vld [vmem:[#allocation10 + $0x8] sm:$0xff]  ;;  %v665_v4 = vmul.f32 %v3432_v1, %v3432_v1  ;;  %v785_v6 = vld [vmem:[#allocation11] sm:$0xff]  ;;  %v694_v8 = vld [vmem:[#allocation10 + $0x10] sm:$0xff]  ;;  %v2932_v38 = vmov 0.0   ;;  %s3751_s15 = sld [smem:[#allocation30_spill]]  ;;  %s635_s12 = sld [smem:[#allocation4]] }
  0xf2   : > { %662 = vadd.xlane.f32.xlu0 %v3432_v1  ;;  %v2280_v5 = vpack.c.bf16 %v693_v3, %v692_v2  ;;  %v786_v7 = vld [vmem:[#allocation11 + $0x8] sm:$0xff]  ;;  %v695_v10 = vld [vmem:[#allocation10 + $0x18] sm:$0xff]  ;;  %v787_v12 = vld [vmem:[#allocation11 + $0x10] sm:$0xff]  ;;  %2131 = vmatprep.mubr.msk.f32.mxu0 %vm2931_vm0, %v2932_v38  ;;  %s3752_s13 = sld [smem:[#allocation34_spill]]  ;;  %s3753_s9 = sld [smem:[#allocation32_spill]]  ;;  %vm972_vm1 = vcmask 261120  }
  0xf3   : > { %v2304_v9 = vpack.c.bf16 %v786_v7, %v785_v6  ;;  %v2283_v11 = vpack.c.bf16 %v695_v10, %v694_v8  ;;  %v788_v13 = vld [vmem:[#allocation11 + $0x18] sm:$0xff]  ;;  %v696_v15 = vld [vmem:[#allocation10 + $0x20] sm:$0xff]  ;;  %v697_v16 = vld [vmem:[#allocation10 + $0x28] sm:$0xff]  ;;  %2166 = vmatprep.mubr.msk.f32.mxu1 %vm2931_vm0, %v2932_v38  ;;  %s2933_s4 = smov 96   ;;  %s3754_s19 = sld [smem:[#allocation36_spill]]  ;;  %vm1054_vm4 = vcmask 64512  }
  0xf4   : > { %2281 = vmatpush3.bf16.msra.mxu0 %v2280_v5  ;;  %v2307_v14 = vpack.c.bf16 %v788_v13, %v787_v12  ;;  %v2286_v17 = vpack.c.bf16 %v697_v16, %v696_v15  ;;  %v789_v18 = vld [vmem:[#allocation11 + $0x20] sm:$0xff]  ;;  %v790_v19 = vld [vmem:[#allocation11 + $0x28] sm:$0xff]  ;;  %v698_v21 = vld [vmem:[#allocation10 + $0x30] sm:$0xff]  ;;  %s2936_s23 = smov 32   ;;  %vm1318_vm5 = vcmask 523520   ;;  %vm1494_vm6 = vcmask 785920  }
  0xf5   : > { %2305 = vmatpush3.bf16.msra.mxu1 %v2304_v9  ;;  %2282 = vmatprep.subr.bf16.mxu0 %v2930_v0  ;;  %v2310_v20 = vpack.c.bf16 %v790_v19, %v789_v18  ;;  %v699_v22 = vld [vmem:[#allocation10 + $0x38] sm:$0xff]  ;;  %v791_v24 = vld [vmem:[#allocation11 + $0x30] sm:$0xff]  ;;  %v700_v27 = vld [vmem:[#allocation10 + $0x40] sm:$0xff]  ;;  %vm1670_vm7 = vcmask 1048320   ;;  %s2008_s24 = sshll.u32 %s3070_s21, 7  ;;  %p3759_p1 = scmp.ne.s32.totalorder %s3740_s6, 0 }
  0xf6   : > { %666 = vadd.xlane.f32.xlu0 %v665_v4  ;;  %2306 = vmatprep.subr.bf16.mxu1 %v2930_v0  ;;  %v2289_v23 = vpack.c.bf16 %v699_v22, %v698_v21  ;;  %v792_v25 = vld [vmem:[#allocation11 + $0x38] sm:$0xff]  ;;  %v701_v28 = vld [vmem:[#allocation10 + $0x48] sm:$0xff]  ;;  %v793_v30 = vld [vmem:[#allocation11 + $0x40] sm:$0xff] }
  0xf7   : > { %v2313_v26 = vpack.c.bf16 %v792_v25, %v791_v24  ;;  %v2292_v29 = vpack.c.bf16 %v701_v28, %v700_v27  ;;  %v794_v31 = vld [vmem:[#allocation11 + $0x48] sm:$0xff]  ;;  %v702_v33 = vld [vmem:[#allocation10 + $0x50] sm:$0xff]  ;;  %v703_v34 = vld [vmem:[#allocation10 + $0x58] sm:$0xff]  ;;  %p636_p10 = scmp.lt.s32.totalorder %s635_s12, 1 }
  0xf8   : > { %2284 = vmatpush3.bf16.msra.mxu0 %v2283_v11  ;;  %v2316_v32 = vpack.c.bf16 %v794_v31, %v793_v30  ;;  %v795_v35 = vld [vmem:[#allocation11 + $0x50] sm:$0xff]  ;;  %v2295_v36 = vpack.c.bf16 %v703_v34, %v702_v33  ;;  %v796_v37 = vld [vmem:[#allocation11 + $0x58] sm:$0xff]  ;;  %v704_v40 = vld [vmem:[#allocation10 + $0x60] sm:$0xff] }
  0xf9   : > { %2285 = vmatprep.subr.bf16.mxu0 %v2930_v0  ;;  %2308 = vmatpush3.bf16.msra.mxu1 %v2307_v14  ;;  %v2319_v39 = vpack.c.bf16 %v796_v37, %v795_v35  ;;  %v705_v41 = vld [vmem:[#allocation10 + $0x68] sm:$0xff]  ;;  %v797_v42 = vld [vmem:[#allocation11 + $0x60] sm:$0xff]  ;;  %v706_v46 = vld [vmem:[#allocation10 + $0x70] sm:$0xff]  ;;  %s3773_s12 = smov (!%p636_p10, %s635_s12), 1 }
  0xfa   : > { %2309 = vmatprep.subr.bf16.mxu1 %v2930_v0  ;;  %v798_v43 = vld [vmem:[#allocation11 + $0x68] sm:$0xff]  ;;  %v2298_v44 = vpack.c.bf16 %v705_v41, %v704_v40  ;;  %v707_v47 = vld [vmem:[#allocation10 + $0x78] sm:$0xff]  ;;  %v799_v48 = vld [vmem:[#allocation11 + $0x70] sm:$0xff]  ;;  %s644_s0 = scalar_lea.vmem %s3752_s13, %s3773_s12  ;;  %s638_s11 = scalar_lea.vmem %s3753_s9, %s3773_s12 }
  0xfb   : > { %v2322_v45 = vpack.c.bf16 %v798_v43, %v797_v42  ;;  %v800_v49 = vld [vmem:[#allocation11 + $0x78] sm:$0xff]  ;;  %v2301_v50 = vpack.c.bf16 %v707_v47, %v706_v46  ;;  %v1989_v61 = vld [vmem:[%s3662_s3] ss:$0 sm:$0xff]  ;;  %v879_v2 = vld [vmem:[#allocation13 + $0x8] sm:$0xff]  ;;  %s650_s5 = scalar_lea.vmem %s3754_s19, %s3773_s12  ;;  %v2934_v42 = vmov 0   ;;  %s633_s13 = scalar_lea.vmem [#allocation16], %s1986_s26 }
  0xfc   : > { %2287 = vmatpush3.bf16.msra.mxu0 %v2286_v17  ;;  %v2325_v51 = vpack.c.bf16 %v800_v49, %v799_v48  ;;  %v878_v63 = vld [vmem:[#allocation13] sm:$0xff]  ;;  %v880_v7 = vld [vmem:[#allocation13 + $0x10] sm:$0xff]  ;;  %v881_v8 = vld [vmem:[#allocation13 + $0x18] sm:$0xff]  ;;  %s3758_s9 = sld [smem:[#allocation39_spill]]  ;;  %s2937_s26 = smov [#allocation16]  }
  0xfd   : > { %2311 = vmatpush3.bf16.msra.mxu1 %v2310_v20  ;;  %2288 = vmatprep.subr.bf16.mxu0 %v2930_v0  ;;  %v1990_v3 = vld [vmem:[%s3751_s15] ss:$0 sm:$0xff]  ;;  %v2328_v5 = vpack.c.bf16 %v879_v2, %v878_v63  ;;  %v2331_v9 = vpack.c.bf16 %v881_v8, %v880_v7  ;;  %v883_v11 = vld [vmem:[#allocation13 + $0x28] sm:$0xff]  ;;  %v884_v13 = vld [vmem:[#allocation13 + $0x30] sm:$0xff]  ;;  %s3757_s15 = sld [smem:[#allocation38_spill]] }
  0xfe   : > { %2312 = vmatprep.subr.bf16.mxu1 %v2930_v0  ;;  %v882_v10 = vld [vmem:[#allocation13 + $0x20] sm:$0xff]  ;;  %v885_v14 = vld [vmem:[#allocation13 + $0x38] sm:$0xff]  ;;  %v887_v17 = vld [vmem:[#allocation13 + $0x48] sm:$0xff] }
  0xff   : > { %v2334_v12 = vpack.c.bf16 %v883_v11, %v882_v10  ;;  %v2337_v15 = vpack.c.bf16 %v885_v14, %v884_v13  ;;  %v886_v16 = vld [vmem:[#allocation13 + $0x40] sm:$0xff]  ;;  %v888_v19 = vld [vmem:[#allocation13 + $0x50] sm:$0xff]  ;;  %v889_v20 = vld [vmem:[#allocation13 + $0x58] sm:$0xff] }
 0x100   : > { %2290 = vmatpush3.bf16.msra.mxu0 %v2289_v23  ;;  %v2340_v18 = vpack.c.bf16 %v887_v17, %v886_v16  ;;  %v2343_v21 = vpack.c.bf16 %v889_v20, %v888_v19  ;;  %v890_v22 = vld [vmem:[#allocation13 + $0x60] sm:$0xff]  ;;  %v891_v23 = vld [vmem:[#allocation13 + $0x68] sm:$0xff]  ;;  %v892_v25 = vld [vmem:[#allocation13 + $0x70] sm:$0xff] }
 0x101   : > { %2314 = vmatpush3.bf16.msra.mxu1 %v2313_v26  ;;  %2291 = vmatprep.subr.bf16.mxu0 %v2930_v0  ;;  %v2346_v24 = vpack.c.bf16 %v891_v23, %v890_v22  ;;  %v893_v26 = vld [vmem:[#allocation13 + $0x78] sm:$0xff]  ;;  %v1992_v28 = vld [vmem:[%s644_s0] ss:$0 sm:$0xff]  ;;  %s1783_s0 = sshll.u32 %s633_s13, 4  ;;  %s3597_s0 = int_to_ptr.vmem [resolvable:$true] %s1783_s0 }
 0x102   : > { %2315 = vmatprep.subr.bf16.mxu1 %v2930_v0  ;;  %v2349_v27 = vpack.c.bf16 %v893_v26, %v892_v25  ;;  %v1991_v31 = vld [vmem:[%s638_s11] ss:$0 sm:$0xff]  ;;  %v691_v41 = vld [vmem:[%s3408_s25] sm:$0xf]  ;;  %s2935_s25 = smov 64   ;;  %s3595_s11 = scalar_lea.hbm %s3758_s9, %s2008_s24 }
 0x103   : > { %vm971_vm2 = vcmp.gt.bf16.partialorder %v691_v41, 0  ;;  %s656_s22 = scalar_lea.vmem %s3757_s15, %s3773_s12  ;;  %s1770_s12 = scalar_lea.sflag [#allocation7], %s3396_s30 }
 0x104   : > { %2293 = vmatpush3.bf16.msra.mxu0 %v2292_v29  ;;  %v1050_v43 = vsel %vm971_vm2, 65537, %v2934_v42  ;;  %s2754_s21 = scalar_lea.vmem %s3597_s0, 128 }
 0x105   : > { %2317 = vmatpush3.bf16.msra.mxu1 %v2316_v32  ;;  %2294 = vmatprep.subr.bf16.mxu0 %v2930_v0  ;;  %p2755_p9 = scmp.ne.s32.totalorder %s3597_s0, %s2754_s21 }
 0x106   : > { %2318 = vmatprep.subr.bf16.mxu1 %v2930_v0 }
 0x107   : > { %p2756_p4 = pnand %p2755_p9, %p3759_p1 }
 0x108   : > { %2296 = vmatpush3.bf16.msra.mxu0 %v2295_v36  ;;  %v1993_v36 = vld [vmem:[%s650_s5] ss:$0 sm:$0xff] }
 0x109   : > { %2320 = vmatpush3.bf16.msra.mxu1 %v2319_v39  ;;  %2297 = vmatprep.subr.bf16.mxu0 %v2930_v0  ;;  %p2757_p13 = pneg %p2756_p4 }
 0x10a   : > { %2321 = vmatprep.subr.bf16.mxu1 %v2930_v0 }
 0x10c   : > { %2299 = vmatpush3.bf16.msra.mxu0 %v2298_v44  ;;  %v1051_v44 = vunpack.c.l.b16 %v1050_v43 }
 0x10d   : > { %2323 = vmatpush3.bf16.msra.mxu1 %v2322_v45  ;;  %2300 = vmatprep.subr.bf16.mxu0 %v2930_v0 }
 0x10e   : > { %2324 = vmatprep.subr.bf16.mxu1 %v2930_v0  ;;  %vm3510_vm3 = vcmp.ne.s32.totalorder %v1051_v44, 0 }
 0x110   : > { %2302 = vmatpush3.bf16.msra.mxu0 %v2301_v50 }
 0x111   : > { %2326 = vmatpush3.bf16.msra.mxu1 %v2325_v51  ;;  %2327 = vmatprep.subr.bf16.mxu0 %v2930_v0 }
 0x112   : > { %2204 = vmatprep.subr.mxu1 %v2932_v38 }
 0x17f   : > { %v663_v52 = vpop.xlane.xlu0 %662 }
 0x180   : > { %v664_v53 = vmul.f32 0.0078125, %v663_v52 }
 0x182   : > { %v669_v55 = vmul.f32 %v664_v53, %v664_v53  ;;  %v671_v59 = vsub.f32 %v3432_v1, %v664_v53 }
 0x183   : > { %v667_v54 = vpop.xlane.xlu0 %666 }
 0x184   : > { %v668_v56 = vmul.f32 0.0078125, %v667_v54 }
 0x186   : > { %v670_v57 = vsub.f32 %v668_v56, %v669_v55 }
 0x188   : > { %v672_v58 = vadd.f32 1e-05, %v670_v57 }
 0x18a   : > { %2556 = vrsqrt.f32 %v672_v58 }
 0x194   : > { %v2557_v60 = vpop.eup %2556 }
 0x195   : > { %v674_v62 = vmul.f32 %v2557_v60, %v671_v59 }
 0x197   : > { %v682_v4 = vmul.f32 %v1989_v61, %v674_v62 }
 0x199   : > { %v690_v6 = vadd.f32 %v1990_v3, %v682_v4 }
 0x19b   : > { %2132 = vmatmul.mubr.f32.vlgmr.msra.gmra.mrb[0].mxu0 %v690_v6  ;;  %2167 = vmatmul.mubr.f32.vlgmr.msra.gmra.mrb[0].mxu1 %v690_v6 }
 0x19c   : > { %2329 = vmatpush3.bf16.msra.mxu0 %v2328_v5  ;;  %2201 = vmatprep.mubr.msk.f32.mxu0 %vm2931_vm0, %v2932_v38 }
 0x19d   : > { %2330 = vmatprep.subr.bf16.mxu0 %v2930_v0  ;;  %2206 = vmatprep.mubr.msk.f32.mxu1 %vm2931_vm0, %v2932_v38 }
 0x1a0   : > { %2332 = vmatpush3.bf16.msra.mxu0 %v2331_v9 }
 0x1a1   : > { %2333 = vmatprep.subr.bf16.mxu0 %v2930_v0 }
 0x1a4   : > { %2335 = vmatpush3.bf16.msra.mxu0 %v2334_v12 }
 0x1a5   : > { %2336 = vmatprep.subr.bf16.mxu0 %v2930_v0 }
 0x1a8   : > { %2338 = vmatpush3.bf16.msra.mxu0 %v2337_v15 }
 0x1a9   : > { %2339 = vmatprep.subr.bf16.mxu0 %v2930_v0 }
 0x1ac   : > { %2341 = vmatpush3.bf16.msra.mxu0 %v2340_v18 }
 0x1ad   : > { %2342 = vmatprep.subr.bf16.mxu0 %v2930_v0 }
 0x1b0   : > { %2344 = vmatpush3.bf16.msra.mxu0 %v2343_v21 }
 0x1b1   : > { %2345 = vmatprep.subr.bf16.mxu0 %v2930_v0 }
 0x1b4   : > { %2347 = vmatpush3.bf16.msra.mxu0 %v2346_v24 }
 0x1b5   : > { %2348 = vmatprep.subr.bf16.mxu0 %v2930_v0 }
 0x1b8   : > { %2350 = vmatpush3.bf16.msra.mxu0 %v2349_v27 }
 0x1b9   : > { %2351 = vmatprep.subr.bf16.mxu0 %v2930_v0 }
 0x1bb   : > { %2202 = vmatmul.mubr.f32.vlgmr.msra.gmra.mrb[2].mxu0 %v690_v6 }
 0x1bc   : > { %2276 = vmatprep.mubr.msk.f32.mxu0 %vm2931_vm0, %v2932_v38 }
 0x26e   : > { %v781_v29 = vpop.f32.mrb[0].mxu0  ;;  %v874_v30 = vpop.f32.mrb[0].mxu1 }
 0x26f   : > { %v3488_v32 = vadd.f32 %v1992_v28, %v874_v30  ;;  %v2133_v33 = vpop.f32.mrb[1].mxu0  ;;  %v2168_v34 = vpop.f32.mrb[1].mxu1  ;;  %v3494_v35 = vadd.f32 %v1991_v31, %v781_v29 }
 0x271   : > { %1145 = vrot.lane.b32.xlu0 %v3488_v32, %s2933_s4  ;;  %2205 = vmatpush3.xpose.msk.msra.mxu1 %vm972_vm1, %v3488_v32 }
 0x272   : > { %2209 = vmatprep.subr.mxu1 %v2932_v38 }
 0x274   : > { %2207 = vmatmul.mubr.msk.f32.vlgmr.msra.gmra.mrb[2].mxu1 %vm972_vm1, %v3494_v35 }
 0x275   : > { %2211 = vmatprep.mubr.msk.f32.mxu1 %vm2931_vm0, %v2932_v38 }
 0x28e   : > { %v967_v37 = vpop.f32.mrb[2].mxu0 }
 0x28f   : > { %v3505_v39 = vadd.f32 %v1993_v36, %v967_v37  ;;  %v2203_v40 = vpop.f32.mrb[3].mxu0 }
 0x291   : > { %2210 = vmatpush3.msra.mxu1 %v3505_v39 }
 0x292   : > { %2214 = vmatprep.subr.mxu1 %v2932_v38 }
 0x2e3   : > { %v1146_v62 = vpop.permute.xlu0 %1145 }
 0x347   : > { %v1045_v45 = vpop.f32.mrb[2].mxu1 }
 0x348   : > { %v1049_v47 = vmul.f32 0.17677669, %v1045_v45  ;;  %v2208_v48 = vpop.f32.mrb[3].mxu1 }
 0x34a   : > { %v1053_v49 = vsel %vm3510_vm3, %v1049_v47, -1e+09 }
 0x34b   : > { %v1055_v50 = vsel %vm1054_vm4, %v1053_v49, -inf }
 0x34c   : > { %1056 = vmax.xlane.f32.xlu1 %v1055_v50 }
 0x3d9   : > { %v1057_v51 = vpop.xlane.xlu1 %1056 }
 0x3da   : > { %v1058_v52 = vsub.f32 %v1053_v49, %v1057_v51 }
 0x3dc   : > { %v1059_v53 = vmul.f32 1.442695, %v1058_v52 }
 0x3de   : > { %2558 = vpow2.f32 %v1059_v53 }
 0x3e8   : > { %v2559_v54 = vpop.eup %2558 }
 0x3e9   : > { %v1061_v55 = vsel %vm1054_vm4, %v2559_v54, 0.0 }
 0x3ea   : > { %1062 = vadd.xlane.f32.xlu1 %v1061_v55 }
 0x3fb   : > { %1143 = vrot.lane.b32.xlu1 %v3494_v35, %s2933_s4 }
 0x477   : > { %v1063_v56 = vpop.xlane.xlu1 %1062 }
 0x478   : > { %2560 = vrcp.f32 %v1063_v56 }
 0x47b   : > { %v1144_v63 = vpop.permute.xlu1 %1143 }
 0x482   : > { %v2561_v57 = vpop.eup %2560 }
 0x483   : > { %v1065_v58 = vmul.f32 %v2561_v57, %v1063_v56 }
 0x485   : > { %v1066_v59 = vsub.f32 2.0, %v1065_v58 }
 0x487   : > { %v1067_v60 = vmul.f32 %v2561_v57, %v1066_v59 }
 0x489   : > { %v1068_v61 = vmul.f32 %v2559_v54, %v1067_v60 }
 0x48b   : > { %2212 = vmatmul.mubr.msk.f32.vlgmr.msra.gmra.mrb[4].mxu1 %vm1054_vm4, %v1068_v61 }
 0x48c   : > { %2215 = vmatpush3.xpose.msk.msra.mxu1 %vm972_vm1, %v1146_v62  ;;  %2216 = vmatprep.mubr.msk.f32.mxu1 %vm2931_vm0, %v2932_v38 }
 0x48d   : > { %2219 = vmatprep.subr.mxu1 %v2932_v38 }
 0x48f   : > { %2217 = vmatmul.mubr.msk.f32.vlgmr.msra.gmra.mrb[6].mxu1 %vm972_vm1, %v1144_v63 }
 0x490   : > { %2221 = vmatprep.mubr.msk.f32.mxu1 %vm2931_vm0, %v2932_v38 }
 0x55e   : > { %v1138_v2 = vpop.f32.mrb[4].mxu1 }
 0x55f   : > { %1142 = vst.msk [vmem:[#allocation2] sm:$0xff] %vm972_vm1, %v1138_v2  ;;  %v2213_v3 = vpop.f32.mrb[5].mxu1 }
 0x560   : > { %v1673_v3 = vld [vmem:[#allocation14] sm:$0xff] }
 0x562   : > { %v1217_v4 = vpop.f32.mrb[6].mxu1 }
 0x563   : > { %v1221_v5 = vmul.f32 0.17677669, %v1217_v4  ;;  %v2218_v6 = vpop.f32.mrb[7].mxu1  ;;  %v1674_v4 = vld [vmem:[#allocation14 + $0x8] sm:$0xff] }
 0x564   : > { %v2352_v6 = vpack.c.bf16 %v1674_v4, %v1673_v3 }
 0x565   : > { %v1222_v7 = vsel %vm3510_vm3, %v1221_v5, -1e+09  ;;  %v1675_v5 = vld [vmem:[#allocation14 + $0x10] sm:$0xff] }
 0x566   : > { %v1223_v8 = vsel %vm1054_vm4, %v1222_v7, -inf  ;;  %2353 = vmatpush3.bf16.msra.mxu0 %v2352_v6 }
 0x567   : > { %1224 = vmax.xlane.f32.xlu1 %v1223_v8  ;;  %2354 = vmatprep.subr.bf16.mxu0 %v2930_v0 }
 0x578   : > { %1322 = vrot.lane.b32.xlu1 %v3488_v32, %s2935_s25 }
 0x57c   : > { %1320 = vrot.lane.b32.xlu1 %v3494_v35, %s2935_s25 }
 0x5f4   : > { %v1225_v9 = vpop.xlane.xlu1 %1224 }
 0x5f5   : > { %v1226_v10 = vsub.f32 %v1222_v7, %v1225_v9  ;;  %v1676_v7 = vld [vmem:[#allocation14 + $0x18] sm:$0xff]  ;;  %v1677_v9 = vld [vmem:[#allocation14 + $0x20] sm:$0xff] }
 0x5f6   : > { %v2355_v8 = vpack.c.bf16 %v1676_v7, %v1675_v5 }
 0x5f7   : > { %v1227_v11 = vmul.f32 1.442695, %v1226_v10  ;;  %v1678_v10 = vld [vmem:[#allocation14 + $0x28] sm:$0xff] }
 0x5f8   : > { %v1323_v20 = vpop.permute.xlu1 %1322  ;;  %2356 = vmatpush3.bf16.msra.mxu0 %v2355_v8 }
 0x5f9   : > { %2562 = vpow2.f32 %v1227_v11  ;;  %v2358_v11 = vpack.c.bf16 %v1678_v10, %v1677_v9  ;;  %2357 = vmatprep.subr.bf16.mxu0 %v2930_v0 }
 0x5fc   : > { %v1321_v22 = vpop.permute.xlu1 %1320  ;;  %2359 = vmatpush3.bf16.msra.mxu0 %v2358_v11 }
 0x5fd   : > { %2360 = vmatprep.subr.bf16.mxu0 %v2930_v0 }
 0x603   : > { %v2563_v12 = vpop.eup %2562 }
 0x604   : > { %v1229_v13 = vsel %vm1054_vm4, %v2563_v12, 0.0 }
 0x605   : > { %1230 = vadd.xlane.f32.xlu0 %v1229_v13  ;;  %v1680_v13 = vld [vmem:[#allocation14 + $0x38] sm:$0xff] }
 0x61b   : > { %1238 = vrot.lane.b32.xlu0 %v3505_v39, %s2933_s4 }
 0x692   : > { %v1231_v14 = vpop.xlane.xlu0 %1230 }
 0x693   : > { %2564 = vrcp.f32 %v1231_v14 }
 0x696   : > { %v1239_v15 = vpop.permute.xlu0 %1238 }
 0x697   : > { %2220 = vmatpush3.msra.mxu1 %v1239_v15  ;;  %v1681_v15 = vld [vmem:[#allocation14 + $0x40] sm:$0xff] }
 0x698   : > { %2224 = vmatprep.subr.mxu1 %v2932_v38 }
 0x69d   : > { %v2565_v16 = vpop.eup %2564 }
 0x69e   : > { %v1233_v17 = vmul.f32 %v2565_v16, %v1231_v14 }
 0x6a0   : > { %v1234_v18 = vsub.f32 2.0, %v1233_v17 }
 0x6a2   : > { %v1235_v19 = vmul.f32 %v2565_v16, %v1234_v18  ;;  %v1682_v16 = vld [vmem:[#allocation14 + $0x48] sm:$0xff]  ;;  %v1683_v18 = vld [vmem:[#allocation14 + $0x50] sm:$0xff] }
 0x6a3   : > { %v2364_v17 = vpack.c.bf16 %v1682_v16, %v1681_v15 }
 0x6a4   : > { %v1236_v21 = vmul.f32 %v2563_v12, %v1235_v19  ;;  %v1679_v12 = vld [vmem:[#allocation14 + $0x30] sm:$0xff]  ;;  %v1684_v19 = vld [vmem:[#allocation14 + $0x58] sm:$0xff] }
 0x6a5   : > { %v2361_v14 = vpack.c.bf16 %v1680_v13, %v1679_v12 }
 0x6a6   : > { %2222 = vmatmul.mubr.msk.f32.vlgmr.msra.gmra.mrb[8].mxu1 %vm1054_vm4, %v1236_v21  ;;  %v1685_v21 = vld [vmem:[#allocation14 + $0x60] sm:$0xff] }
 0x6a7   : > { %2225 = vmatpush3.xpose.msk.msra.mxu1 %vm972_vm1, %v1323_v20  ;;  %2226 = vmatprep.mubr.msk.f32.mxu1 %vm2931_vm0, %v2932_v38  ;;  %v2367_v20 = vpack.c.bf16 %v1684_v19, %v1683_v18 }
 0x6a8   : > { %2229 = vmatprep.subr.mxu1 %v2932_v38  ;;  %2362 = vmatpush3.bf16.msra.mxu0 %v2361_v14 }
 0x6a9   : > { %2363 = vmatprep.subr.bf16.mxu0 %v2930_v0 }
 0x6aa   : > { %2227 = vmatmul.mubr.msk.f32.vlgmr.msra.gmra.mrb[10].mxu1 %vm972_vm1, %v1321_v22  ;;  %v1686_v22 = vld [vmem:[#allocation14 + $0x68] sm:$0xff] }
 0x6ab   : > { %2231 = vmatprep.mubr.msk.f32.mxu1 %vm2931_vm0, %v2932_v38 }
 0x6ac   : > { %2365 = vmatpush3.bf16.msra.mxu0 %v2364_v17 }
 0x6ad   : > { %2366 = vmatprep.subr.bf16.mxu0 %v2930_v0 }
 0x6b0   : > { %2368 = vmatpush3.bf16.msra.mxu0 %v2367_v20 }
 0x6b1   : > { %2369 = vmatprep.subr.bf16.mxu0 %v2930_v0 }
 0x779   : > { %v1310_v23 = vpop.f32.mrb[8].mxu1 }
 0x77a   : > { %v2223_v24 = vpop.f32.mrb[9].mxu1 }
 0x77b   : > { %v1687_v24 = vld [vmem:[#allocation14 + $0x70] sm:$0xff] }
 0x77d   : > { %v1394_v25 = vpop.f32.mrb[10].mxu1 }
 0x77e   : > { %v1398_v26 = vmul.f32 0.17677669, %v1394_v25  ;;  %v2228_v27 = vpop.f32.mrb[11].mxu1  ;;  %v1688_v25 = vld [vmem:[#allocation14 + $0x78] sm:$0xff] }
 0x780   : > { %v1399_v28 = vsel %vm3510_vm3, %v1398_v26, -1e+09  ;;  %v2373_v26 = vpack.c.bf16 %v1688_v25, %v1687_v24 }
 0x781   : > { %v1400_v29 = vsel %vm1054_vm4, %v1399_v28, -inf }
 0x782   : > { %1401 = vmax.xlane.f32.xlu1 %v1400_v29 }
 0x793   : > { %1498 = vrot.lane.b32.xlu1 %v3488_v32, %s2936_s23 }
 0x797   : > { %1496 = vrot.lane.b32.xlu1 %v3494_v35, %s2936_s23 }
 0x80f   : > { %v1402_v30 = vpop.xlane.xlu1 %1401 }
 0x810   : > { %v1403_v31 = vsub.f32 %v1399_v28, %v1402_v30 }
 0x812   : > { %v1404_v33 = vmul.f32 1.442695, %v1403_v31 }
 0x813   : > { %v1499_v43 = vpop.permute.xlu1 %1498 }
 0x814   : > { %2566 = vpow2.f32 %v1404_v33  ;;  %v2006_v33 = vld [vmem:[%s656_s22] ss:$0 sm:$0xff] }
 0x817   : > { %v1497_v45 = vpop.permute.xlu1 %1496 }
 0x81e   : > { %v2567_v34 = vpop.eup %2566 }
 0x81f   : > { %v1406_v36 = vsel %vm1054_vm4, %v2567_v34, 0.0 }
 0x820   : > { %1407 = vadd.xlane.f32.xlu0 %v1406_v36 }
 0x836   : > { %1414 = vrot.lane.b32.xlu0 %v3505_v39, %s2935_s25 }
 0x8ad   : > { %v1408_v37 = vpop.xlane.xlu0 %1407 }
 0x8ae   : > { %2568 = vrcp.f32 %v1408_v37 }
 0x8b1   : > { %v1415_v40 = vpop.permute.xlu0 %1414 }
 0x8b2   : > { %2230 = vmatpush3.msra.mxu1 %v1415_v40 }
 0x8b3   : > { %2234 = vmatprep.subr.mxu1 %v2932_v38 }
 0x8b8   : > { %v2569_v32 = vpop.eup %2568 }
 0x8b9   : > { %v1410_v41 = vmul.f32 %v2569_v32, %v1408_v37 }
 0x8bb   : > { %v1411_v35 = vsub.f32 2.0, %v1410_v41 }
 0x8bd   : > { %v1412_v42 = vmul.f32 %v2569_v32, %v1411_v35 }
 0x8bf   : > { %v1413_v44 = vmul.f32 %v2567_v34, %v1412_v42 }
 0x8c1   : > { %2232 = vmatmul.mubr.msk.f32.vlgmr.msra.gmra.mrb[12].mxu1 %vm1054_vm4, %v1413_v44 }
 0x8c2   : > { %2235 = vmatpush3.xpose.msk.msra.mxu1 %vm972_vm1, %v1499_v43  ;;  %2236 = vmatprep.mubr.msk.f32.mxu1 %vm2931_vm0, %v2932_v38 }
 0x8c3   : > { %2239 = vmatprep.subr.mxu1 %v2932_v38 }
 0x8c5   : > { %2237 = vmatmul.mubr.msk.f32.vlgmr.msra.gmra.mrb[14].mxu1 %vm972_vm1, %v1497_v45 }
 0x8c6   : > { %2241 = vmatprep.mubr.msk.f32.mxu1 %vm2931_vm0, %v2932_v38 }
 0x994   : > { %v1486_v47 = vpop.f32.mrb[12].mxu1 }
 0x995   : > { %v2233_v48 = vpop.f32.mrb[13].mxu1 }
 0x998   : > { %v1570_v49 = vpop.f32.mrb[14].mxu1 }
 0x999   : > { %v1574_v50 = vmul.f32 0.17677669, %v1570_v49  ;;  %v2238_v51 = vpop.f32.mrb[15].mxu1 }
 0x99b   : > { %v1575_v52 = vsel %vm3510_vm3, %v1574_v50, -1e+09 }
 0x99c   : > { %v1576_v53 = vsel %vm1054_vm4, %v1575_v52, -inf }
 0x99d   : > { %1577 = vmax.xlane.f32.xlu0 %v1576_v53 }
 0x9b3   : > { %1590 = vrot.lane.b32.xlu0 %v3505_v39, %s2936_s23 }
 0x9b7   : > { %1491 = vrot.lane.b32.xlu0 %v1486_v47, %s2935_s25 }
 0xa2a   : > { %v1578_v54 = vpop.xlane.xlu0 %1577 }
 0xa2b   : > { %v1579_v55 = vsub.f32 %v1575_v52, %v1578_v54 }
 0xa2d   : > { %v1580_v56 = vmul.f32 1.442695, %v1579_v55 }
 0xa2e   : > { %v1591_v38 = vpop.permute.xlu0 %1590 }
 0xa2f   : > { %2570 = vpow2.f32 %v1580_v56  ;;  %2240 = vmatpush3.msra.mxu1 %v1591_v38 }
 0xa32   : > { %v1492_v39 = vpop.permute.xlu0 %1491 }
 0xa39   : > { %v2571_v57 = vpop.eup %2570 }
 0xa3a   : > { %v1582_v58 = vsel %vm1054_vm4, %v2571_v57, 0.0 }
 0xa3b   : > { %1583 = vadd.xlane.f32.xlu1 %v1582_v58 }
 0xa4c   : > { %1315 = vrot.lane.b32.xlu1 %v1310_v23, %s2936_s23  ;;  %v2370_v23 = vpack.c.bf16 %v1686_v22, %v1685_v21 }
 0xa4e   : > { %2371 = vmatpush3.bf16.msra.mxu0 %v2370_v23 }
 0xa4f   : > { %2372 = vmatprep.subr.bf16.mxu0 %v2930_v0 }
 0xa52   : > { %2374 = vmatpush3.bf16.msra.mxu0 %v2373_v26 }
 0xac8   : > { %v1584_v46 = vpop.xlane.xlu1 %1583 }
 0xac9   : > { %2572 = vrcp.f32 %v1584_v46 }
 0xacc   : > { %v1316_v59 = vpop.permute.xlu1 %1315 }
 0xacd   : > { %1319 = vst.msk [vmem:[#allocation2] sm:$0xff] %vm1318_vm5, %v1316_v59 }
 0xace   : > { %1495 = vst.msk [vmem:[#allocation2] sm:$0xff] %vm1494_vm6, %v1492_v39 }
 0xad3   : > { %v2573_v60 = vpop.eup %2572 }
 0xad4   : > { %v1586_v61 = vmul.f32 %v2573_v60, %v1584_v46 }
 0xad6   : > { %v1587_v62 = vsub.f32 2.0, %v1586_v61 }
 0xad8   : > { %v1588_v63 = vmul.f32 %v2573_v60, %v1587_v62 }
 0xada   : > { %v1589_v2 = vmul.f32 %v2571_v57, %v1588_v63 }
 0xadc   : > { %2242 = vmatmul.mubr.msk.f32.vlgmr.msra.gmra.mrb[16].mxu1 %vm1054_vm4, %v1589_v2 }
 0xbaf   : > { %v1662_v27 = vpop.f32.mrb[16].mxu1 }
 0xbb0   : > { %1667 = vrot.lane.b32.xlu1 %v1662_v27, %s2933_s4  ;;  %v2243_v28 = vpop.f32.mrb[17].mxu1  ;;  %s2758_s4 = sshll.u32 %s2937_s26, 4  ;;  %s2759_s4 = int_to_ptr.vmem [resolvable:$false] %s2758_s4 }
 0xbb1   : > { %s2760_s1 = scalar_lea.vmem %s2759_s4, 256  ;;  %p2761_p6 = scmp.lt.s32.totalorder %s3597_s0, %s2759_s4 }
 0xbb2   : > { %p2762_p3 = scmp.lt.s32.totalorder %s2760_s1, %s2754_s21 }
 0xbb4   : > { %p2763_p12 = por %p2762_p3, %p2761_p6 }
 0xbb6   : > { %p2764_p5 = pnand %p2763_p12, %p2757_p13 }
 0xc22   : > { %v1668_v29 = vpop.permute.xlu1 %1667 }
 0xc23   : > { %1671 = vst.msk [vmem:[#allocation2] sm:$0xff] %vm1670_vm7, %v1668_v29 }
 0xc2a   : > { %v1672_v30 = vld [vmem:[#allocation2] sm:$0xff] }
 0xc2b   : > { %2277 = vmatmul.mubr.f32.vlgmr.msra.gmra.mrb[4].mxu0 %v1672_v30 }
 0xcfe   : > { %v1755_v31 = vpop.f32.mrb[4].mxu0 }
 0xcff   : > { %v1759_v0 = vadd.f32 %v1755_v31, %v3432_v1  ;;  %v2278_v34 = vpop.f32.mrb[5].mxu0 }
 0xd01   : > { %v1767_v36 = vadd.f32 %v2006_v33, %v1759_v0 }
 0xd03   : > { %1768 = vst [vmem:[%s633_s13] sm:$0xff] %v1767_v36 }
 0xd04   : > { %2767 = shalt.err (!%p2764_p5)
}
 0xd05   : > { %s2768_s30 = scalar_lea.hbm %s3595_s11, 128  ;;  %s2772_s5 = scalar_lea.hbm %s3758_s9, 256 }
 0xd06   : > { %p2769_p8 = scmp.ne.s32.totalorder %s3595_s11, %s2768_s30  ;;  %p2773_p11 = scmp.lt.u32.totalorder %s3595_s11, %s3758_s9 }
 0xd07   : > { %p2774_p7 = scmp.lt.u32.totalorder %s2772_s5, %s2768_s30  ;;  %p2776_p9 = scmp.lt.u32.totalorder %s2768_s30, %s3595_s11 }
 0xd08   : > { %p2770_p0 = pnand %p2769_p8, %p3759_p1 }
 0xd09   : > { %p2775_p10 = por %p2774_p7, %p2773_p11 }
 0xd0a   : > { %p2771_p2 = pneg %p2770_p0 }
 0xd0b   : > { %p2777_p4 = por %p2776_p9, %p2775_p10 }
 0xd0d   : > { %p2778_p13 = pnand %p2777_p4, %p2771_p2 }
 0xd0f   : > { %2781 = shalt.err (!%p2778_p13)
}
 0xd10   : > { %2387 = dma.vmem_to_hbm [thread:$0]  (%p3759_p1), %s3597_s0, 128, %s3595_s11, %s1770_s12  }
 0xd11 PF: > { %s1795_s8 = sand.u32 1, %s2908_s17   ;;  %p3760_p6 = scmp.ne.s32.totalorder %s3741_s16, 0 }
 0xd12   : > { %p3761_p3 = scmp.ge.s32.totalorder %s2920_s20, 2  ;;  %s1796_s29 = scalar_lea.sflag [#allocation7], %s1795_s8 }
 0xd14   : > { %p2410_p12 = pnand %p3761_p3, %p3760_p6 }
 0xd16   : > { %2871 = dma.done.wait (!%p2410_p12), %s1796_s29, 128  }
 0xd17   : > { %2873 = vsyncadd (!%p2410_p12), %s1796_s29, 4294967168  ;;  %s3762_s29 = sld [smem:[#allocation24_spill]]  ;;  %s3763_s14 = sld [smem:[#allocation25_spill]] }
 0xd18   : > { %s3764_s0 = sld [smem:[#allocation26_spill]]  ;;  %s3765_s6 = sld [smem:[#allocation27_spill]] }
 0xd19   : > { %s3766_s19 = sld [smem:[#allocation28_spill]]  ;;  %s3767_s22 = smov %s3293_s27 }
 0xd1a   : > { %p32_p1 = scmp.ge.s32.totalorder %s3293_s27, 4   ;;  %s3768_s27 = smov %s2880_s28 }
 0xd1b   : > { %s3630_s28 = smov 0   ;;  %s3635_s30 = smov 0  }
 0xd1c   : > { %s3640_s15 = smov 0   ;;  %s3645_s16 = smov 0  }
 0xd1d   : > { %s3769_s17 = smov %s2912_s18  ;;  %s3771_s20 = smov %s3767_s22 }
 0xd1e   : > { %s3770_s18 = smov %s3765_s6  ;;  %34 = sbr.rel (!%p32_p1) target bundleno = 26 (0x1a), region = 158 }
 0xd25   :  { %1801 = vsyncpa [#allocation6], 1 }
 0xd26   :  { %1803 = vsyncpa [#allocation6 + $0x1], 1 }
 0xd27   :  { %1804 = vsyncpa [#allocation9], 1 }
 0xd28   :  { %1806 = vsyncpa [#allocation9 + $0x1], 1 }
 0xd29   :  { %1807 = vsyncpa [#allocation12], 1 }
 0xd2a   :  { %1808 = vsyncpa [#allocation15], 1 }
 0xd2b   :  { %1809 = vsyncpa [#allocation7], 1 }
 0xd2c   :  { %1811 = vsyncpa [#allocation7 + $0x1], 1 }

</bundles_post_ra>
